<compile_context>
chip_gen: v7x
topology: tpu7x:2x2x1
jax: 0.10.0
libtpu: 0.0.40
codegen_flags: <defaults>
</compile_context>

<pallas_src>
import functools

import jax
import jax.numpy as jnp
from jax import lax
from jax.experimental import pallas as pl
from jax.experimental.pallas import tpu as pltpu


def _num_tensorcores_per_chip():
    """Best-effort detection: v7x has 2 TensorCores/chip, earlier TPUs have 1."""
    try:
        kind = jax.devices()[0].device_kind.lower()
        if "v7" in kind:
            return 2
    except Exception:
        pass
    return 1


def _head_kernel(x_ref, wqkv_ref, o_ref, *, hp):
    # x_ref:    (Bc, T, C)   bf16   one batch chunk
    # wqkv_ref: (C, 3*Hp)    bf16   [ Wk | Wq * scale | Wv ], zero-padded to Hp lanes
    # o_ref:    (Bc, T, Hp)  input dtype (f32 here)
    bc, t, c = x_ref.shape

    # One wide MXU push for all three projections over the whole chunk.
    x2d = x_ref[...].reshape(bc * t, c)                                # (Bc*T, C)
    qkv = jnp.dot(x2d, wqkv_ref[...],
                  preferred_element_type=jnp.float32)                  # (Bc*T, 3Hp) f32
    qkv = qkv.reshape(bc, t, 3 * hp)

    k = qkv[..., 0 * hp:1 * hp]                                        # (Bc, T, Hp)
    q = qkv[..., 1 * hp:2 * hp]    # 1/sqrt(head_size) already folded into Wq
    v = qkv[..., 2 * hp:3 * hp]

    # Scores; padded lanes of q/k are exactly 0 -> contribute nothing.
    wei = jnp.einsum("btd,bsd->bts",
                     q.astype(jnp.bfloat16), k.astype(jnp.bfloat16),
                     preferred_element_type=jnp.float32)               # (Bc, T, T)

    row = lax.broadcasted_iota(jnp.int32, (t, t), 0)
    col = lax.broadcasted_iota(jnp.int32, (t, t), 1)
    wei = jnp.where((col <= row)[None, :, :], wei, -jnp.inf)           # causal mask
    # (diagonal never masked -> every row has a finite entry, no NaN risk)

    # Numerically-stable softmax; reciprocal on the EUP (free slot).
    m = jnp.max(wei, axis=-1, keepdims=True)
    e = jnp.exp(wei - m)
    denom = jnp.sum(e, axis=-1, keepdims=True)
    p = e * pl.reciprocal(denom, approx=True)

    # Dropout: eval mode => identity.

    out = jnp.einsum("bts,bsd->btd",
                     p.astype(jnp.bfloat16), v.astype(jnp.bfloat16),
                     preferred_element_type=jnp.float32)               # (Bc, T, Hp)
    o_ref[...] = out.astype(o_ref.dtype)


@jax.jit
def head_forward(x, wk, wq, wv):
    """x: (B, T, C); wk/wq/wv: (C, H) (transposed nn.Linear.weight). -> (B, T, H)."""
    B, T, C = x.shape
    H = wk.shape[-1]
    Hp = ((H + 127) // 128) * 128                # lane-dense head width
    scale = float(H) ** -0.5                     # uses the REAL head_size
    out_dtype = x.dtype

    # Fused, lane-dense, pre-scaled bf16 weight: [ Wk | Wq*scale | Wv ], (C, 3*Hp).
    # NOTE: constant per-parameter transform -- in a real model cache this once.
    def pad(w):
        return jnp.pad(w, ((0, 0), (0, Hp - H)))

    w_qkv = jnp.concatenate([pad(wk), pad(wq * scale), pad(wv)],
                            axis=1).astype(jnp.bfloat16)               # (C, 3*Hp) bf16

    x_bf16 = x.astype(jnp.bfloat16)

    # Grid: dual-TC chips (v7x) -> split batch across cores ("parallel");
    # single-TC chips (v5e/v6e) -> one step with the whole batch.
    n_cores = _num_tensorcores_per_chip()
    n_steps = n_cores if (n_cores > 1 and B % n_cores == 0) else 1
    Bc = B // n_steps

    out_padded = pl.pallas_call(
        functools.partial(_head_kernel, hp=Hp),
        out_shape=jax.ShapeDtypeStruct((B, T, Hp), out_dtype),
        grid_spec=pltpu.PrefetchScalarGridSpec(
            num_scalar_prefetch=0,
            grid=(n_steps,),
            in_specs=[
                # x: one batch chunk per step, kernel sees (Bc, T, C)
                pl.BlockSpec((Bc, T, C), lambda b: (b, 0, 0)),
                # fused QKV weight: constant index_map -> resident, single-buffered
                pl.BlockSpec((C, 3 * Hp), lambda b: (0, 0),
                             pipeline_mode=pl.Buffered(1)),
            ],
            out_specs=pl.BlockSpec((Bc, T, Hp), lambda b: (b, 0, 0)),
        ),
        compiler_params=pltpu.CompilerParams(
            dimension_semantics=("parallel",),
        ),
    )(x_bf16, w_qkv)

    return out_padded[..., :H]


def head_forward_ref(x, wk, wq, wv):
    """Pure-JAX f32 reference matching the PyTorch forward (eval mode)."""
    k = x @ wk
    q = x @ wq
    v = x @ wv
    H = k.shape[-1]
    wei = jnp.einsum("btk,bsk->bts", q, k) * (H ** -0.5)
    T = x.shape[1]
    tril = jnp.tril(jnp.ones((T, T), dtype=bool))
    wei = jnp.where(tril[None, :, :], wei, -jnp.inf)
    wei = jax.nn.softmax(wei, axis=-1)
    return wei @ v


if __name__ == "__main__":
    # Shapes implied by the module: T = block_size = 128, C = n_embd = 384,
    # head_size = 64 (typical n_embd // n_head), small batch B = 2.
    B, T, C, H = 2, 128, 384, 64

    key = jax.random.PRNGKey(0)
    kx, kk, kq, kv = jax.random.split(key, 4)

    x = jax.random.normal(kx, (B, T, C), dtype=jnp.float32)

    # nn.Linear default init: U(-1/sqrt(C), 1/sqrt(C)); stored as (C, H).
    bound = 1.0 / (C ** 0.5)
    wk = jax.random.uniform(kk, (C, H), jnp.float32, -bound, bound)
    wq = jax.random.uniform(kq, (C, H), jnp.float32, -bound, bound)
    wv = jax.random.uniform(kv, (C, H), jnp.float32, -bound, bound)

    out = head_forward(x, wk, wq, wv)
    out = jax.block_until_ready(out)

    ref = head_forward_ref(x, wk, wq, wv)
    assert out.shape == (B, T, H), out.shape
    # bf16 MXU inputs + approx reciprocal => loose-ish tolerance vs. f32 ref.
    assert jnp.allclose(out, ref, atol=5e-2, rtol=5e-2), float(
        jnp.max(jnp.abs(out - ref))
    )

    print("KERNEL_OK")
</pallas_src>

<mosaic_0001>
module attributes {stable_mosaic.version = 11 : i64} {
  func.func @_head_kernel(%arg0: i32, %arg1: memref<2x128x384xbf16, #tpu.memory_space<vmem>>, %arg2: memref<384x384xbf16, #tpu.memory_space<vmem>>, %arg3: memref<2x128x128xf32, #tpu.memory_space<vmem>>) attributes {dimension_semantics = [#tpu.dimension_semantics<parallel>], iteration_bounds = array<i64: 1>, scalar_prefetch = 0 : i64, scratch_operands = 0 : i64, tpu.core_type = #tpu.core_type<tc>, window_params = [{transform_indices = @transform_0, window_bounds = array<i64: 2, 128, 384>}, {pipeline_mode = #tpu.pipeline_mode<synchronous>, transform_indices = @transform_1, window_bounds = array<i64: 384, 384>}, {transform_indices = @transform_2, window_bounds = array<i64: 2, 128, 128>}]} {
    %c0 = arith.constant 0 : index
    %c0_0 = arith.constant 0 : index
    %c0_1 = arith.constant 0 : index
    %0 = vector.load %arg1[%c0, %c0_0, %c0_1] : memref<2x128x384xbf16, #tpu.memory_space<vmem>>, vector<2x128x384xbf16>
    %1 = vector.shape_cast %0 : vector<2x128x384xbf16> to vector<256x384xbf16>
    %c0_2 = arith.constant 0 : index
    %c0_3 = arith.constant 0 : index
    %2 = vector.load %arg2[%c0_2, %c0_3] : memref<384x384xbf16, #tpu.memory_space<vmem>>, vector<384x384xbf16>
    %cst = arith.constant dense<0.000000e+00> : vector<256x384xf32>
    %3 = tpu.matmul %1, %2, %cst {dimension_numbers = #tpu.dot_dimension_numbers<[1], [0], [0], [1], [0, 0, 1, 1], [], []>} : vector<256x384xbf16>, vector<384x384xbf16>, vector<256x384xf32> -> vector<256x384xf32>
    %4 = vector.shape_cast %3 : vector<256x384xf32> to vector<2x128x384xf32>
    %5 = vector.extract_strided_slice %4 {offsets = [0, 0, 0], sizes = [2, 128, 128], strides = [1, 1, 1]} : vector<2x128x384xf32> to vector<2x128x128xf32>
    %6 = vector.extract_strided_slice %4 {offsets = [0, 0, 128], sizes = [2, 128, 128], strides = [1, 1, 1]} : vector<2x128x384xf32> to vector<2x128x128xf32>
    %7 = vector.extract_strided_slice %4 {offsets = [0, 0, 256], sizes = [2, 128, 128], strides = [1, 1, 1]} : vector<2x128x384xf32> to vector<2x128x128xf32>
    %8 = arith.truncf %6 : vector<2x128x128xf32> to vector<2x128x128xbf16>
    %9 = arith.truncf %5 : vector<2x128x128xf32> to vector<2x128x128xbf16>
    "tpu.trace_start"() <{level = 10 : i32, message = "btd,bsd->bts"}> : () -> ()
    %cst_4 = arith.constant dense<0.000000e+00> : vector<2x128x128xf32>
    %10 = tpu.matmul %8, %9, %cst_4 {dimension_numbers = #tpu.dot_dimension_numbers<[2], [2], [1], [1], [0, 0, 0, 1, 1, 1], [0], [0]>} : vector<2x128x128xbf16>, vector<2x128x128xbf16>, vector<2x128x128xf32> -> vector<2x128x128xf32>
    "tpu.trace_stop"() : () -> ()
    %11 = tpu.iota {dimensions = array<i32: 0>} : vector<128x128xi32>
    %12 = tpu.iota {dimensions = array<i32: 1>} : vector<128x128xi32>
    %13 = arith.cmpi sle, %12, %11 : vector<128x128xi32>
    %14 = vector.shape_cast %13 : vector<128x128xi1> to vector<1x128x128xi1>
    %cst_5 = arith.constant 0xFF800000 : f32
    %15 = vector.shape_cast %14 : vector<1x128x128xi1> to vector<1x128x128xi1>
    %16 = vector.broadcast %15 : vector<1x128x128xi1> to vector<2x128x128xi1>
    %17 = vector.broadcast %cst_5 : f32 to vector<2x128x128xf32>
    %18 = arith.select %16, %10, %17 : vector<2x128x128xi1>, vector<2x128x128xf32>
    %cst_6 = arith.constant dense<0xFF800000> : vector<2x128xf32>
    %19 = vector.multi_reduction <maximumf>, %18, %cst_6 [2] : vector<2x128x128xf32> to vector<2x128xf32>
    %20 = vector.shape_cast %19 : vector<2x128xf32> to vector<2x128x1xf32>
    %21 = vector.broadcast %20 : vector<2x128x1xf32> to vector<2x128x128xf32>
    %22 = arith.subf %18, %21 : vector<2x128x128xf32>
    %23 = math.exp %22 : vector<2x128x128xf32>
    %cst_7 = arith.constant dense<0.000000e+00> : vector<2x128xf32>
    %24 = vector.multi_reduction <add>, %23, %cst_7 [2] : vector<2x128x128xf32> to vector<2x128xf32>
    %25 = vector.shape_cast %24 : vector<2x128xf32> to vector<2x128x1xf32>
    %26 = tpu.reciprocal %25 {approx = true} : vector<2x128x1xf32> -> vector<2x128x1xf32>
    %27 = vector.broadcast %26 : vector<2x128x1xf32> to vector<2x128x128xf32>
    %28 = arith.mulf %23, %27 : vector<2x128x128xf32>
    %29 = arith.truncf %28 : vector<2x128x128xf32> to vector<2x128x128xbf16>
    %30 = arith.truncf %7 : vector<2x128x128xf32> to vector<2x128x128xbf16>
    "tpu.trace_start"() <{level = 10 : i32, message = "bts,bsd->btd"}> : () -> ()
    %cst_8 = arith.constant dense<0.000000e+00> : vector<2x128x128xf32>
    %31 = tpu.matmul %29, %30, %cst_8 {dimension_numbers = #tpu.dot_dimension_numbers<[2], [1], [1], [2], [0, 0, 0, 1, 1, 2], [0], [0]>} : vector<2x128x128xbf16>, vector<2x128x128xbf16>, vector<2x128x128xf32> -> vector<2x128x128xf32>
    "tpu.trace_stop"() : () -> ()
    %c0_9 = arith.constant 0 : index
    %c0_10 = arith.constant 0 : index
    %c0_11 = arith.constant 0 : index
    %32 = vector.load %arg3[%c0_9, %c0_10, %c0_11] : memref<2x128x128xf32, #tpu.memory_space<vmem>>, vector<2x128x128xf32>
    tpu.vector_store %arg3[%c0_9, %c0_10, %c0_11], %31 {strides = array<i32>} : memref<2x128x128xf32, #tpu.memory_space<vmem>>, vector<2x128x128xf32>,
    return
  }
  func.func @transform_0(%arg0: i32) -> (i32, i32, i32) {
    %c0_i32 = arith.constant 0 : i32
    %c0_i32_0 = arith.constant 0 : i32
    %c0_i32_1 = arith.constant 0 : i32
    return %arg0, %c0_i32, %c0_i32_0 : i32, i32, i32
  }
  func.func @transform_1(%arg0: i32) -> (i32, i32) {
    %c0_i32 = arith.constant 0 : i32
    %c0_i32_0 = arith.constant 0 : i32
    %c0_i32_1 = arith.constant 0 : i32
    return %c0_i32, %c0_i32_0 : i32, i32
  }
  func.func @transform_2(%arg0: i32) -> (i32, i32, i32) {
    %c0_i32 = arith.constant 0 : i32
    %c0_i32_0 = arith.constant 0 : i32
    %c0_i32_1 = arith.constant 0 : i32
    return %arg0, %c0_i32, %c0_i32_0 : i32, i32, i32
  }
}

</mosaic_0001>

<bundles_post_ra>
// kernel: head_forward.1
= control target key start
LH: loop header
LB: loop body
LE: loop exit
PB: predicated region body
PF: predicated region fallthrough
CT: control target
= control target key end

     0   :  { %s4331_s1 = inlined_call_operand.vmem [shape: bf16[384,384], index: 1, kind: input, shape index: {}]   ;;  %s4332_s0 = inlined_call_operand.vmem [shape: bf16[2,128,384], index: 0, kind: input, shape index: {}]   ;;  %s4333_s2 = inlined_call_operand.vmem [shape: f32[2,128,128], index: 2, kind: output, shape index: {}]  }
   0x1   :  { %v2956_v0 = vld [vmem:[%s4331_s1 + $0x4] ss:$12 sps:$4 sm:$0xff]   ;;  %v2958_v1 = vld [vmem:[%s4331_s1] ss:$12 sps:$4 sm:$0xff]   ;;  %v2959_v2 = vld [vmem:[%s4331_s1 + $0x1c] ss:$12 sps:$4 sm:$0xff]  }
   0x2   :  { %812 = vmatprep.subr.bf16.mxu0 %v2956_v0  ;;  %v2961_v3 = vld [vmem:[%s4331_s1 + $0x18] ss:$12 sps:$4 sm:$0xff]   ;;  %v2962_v4 = vld [vmem:[%s4331_s1 + $0x34] ss:$12 sps:$4 sm:$0xff]   ;;  %v2964_v5 = vld [vmem:[%s4331_s1 + $0x30] ss:$12 sps:$4 sm:$0xff]  }
   0x3   :  { %813 = vmatpush1.bf16.msra.mxu0 %v2958_v1  ;;  %v2965_v6 = vld [vmem:[%s4331_s1 + $0x4c] ss:$12 sps:$4 sm:$0xff]   ;;  %v2967_v7 = vld [vmem:[%s4331_s1 + $0x48] ss:$12 sps:$4 sm:$0xff]   ;;  %v2968_v8 = vld [vmem:[%s4331_s1 + $0x64] ss:$12 sps:$4 sm:$0xff]  }
   0x4   :  { %814 = vmatprep.subr.bf16.mxu0 %v2959_v2  ;;  %v2970_v9 = vld [vmem:[%s4331_s1 + $0x60] ss:$12 sps:$4 sm:$0xff]   ;;  %v2971_v10 = vld [vmem:[%s4331_s1 + $0x7c] ss:$12 sps:$4 sm:$0xff]   ;;  %v2973_v11 = vld [vmem:[%s4331_s1 + $0x78] ss:$12 sps:$4 sm:$0xff]  }
   0x5   :  { %v2974_v12 = vld [vmem:[%s4331_s1 + $0x94] ss:$12 sps:$4 sm:$0xff]   ;;  %v3006_v13 = vld [vmem:[%s4332_s0 + $0x4] ss:$12 sps:$4 sm:$0xff]   ;;  %v2977_v15 = vld [vmem:[%s4331_s1 + $0xac] ss:$12 sps:$4 sm:$0xff]  }
   0x6   :  { %v2976_v14 = vld [vmem:[%s4331_s1 + $0x90] ss:$12 sps:$4 sm:$0xff]   ;;  %844 = vmatprep.mubr.bf16.mxu0 %v3006_v13  ;;  %1230 = vmatprep.mubr.bf16.mxu1 %v3006_v13  ;;  %v2979_v16 = vld [vmem:[%s4331_s1 + $0xa8] ss:$12 sps:$4 sm:$0xff]   ;;  %v2982_v18 = vld [vmem:[%s4331_s1 + $0xc0] ss:$12 sps:$4 sm:$0xff]  }
   0x7   :  { %815 = vmatpush1.bf16.msra.mxu0 %v2961_v3  ;;  %v2980_v17 = vld [vmem:[%s4331_s1 + $0xc4] ss:$12 sps:$4 sm:$0xff]   ;;  %v2983_v19 = vld [vmem:[%s4331_s1 + $0xdc] ss:$12 sps:$4 sm:$0xff]   ;;  %v2986_v21 = vld [vmem:[%s4331_s1 + $0xf4] ss:$12 sps:$4 sm:$0xff]  }
   0x8   :  { %816 = vmatprep.subr.bf16.mxu0 %v2962_v4  ;;  %v2985_v20 = vld [vmem:[%s4331_s1 + $0xd8] ss:$12 sps:$4 sm:$0xff]   ;;  %v2988_v22 = vld [vmem:[%s4331_s1 + $0xf0] ss:$12 sps:$4 sm:$0xff]   ;;  %v3040_v24 = vld [vmem:[%s4331_s1 + $0xc8] ss:$12 sps:$4 sm:$0xff]  }
   0x9   :  { %v2989_v23 = vld [vmem:[%s4331_s1 + $0x10c] ss:$12 sps:$4 sm:$0xff]   ;;  %v3041_v25 = vld [vmem:[%s4331_s1 + $0x8] ss:$12 sps:$4 sm:$0xff]   ;;  %2515 = vmatprep.subr.bf16.mxu1 %v3040_v24  ;;  %v2992_v29 = vld [vmem:[%s4331_s1 + $0x124] ss:$12 sps:$4 sm:$0xff]  }
   0xa   :  { %v3042_v26 = vld [vmem:[%s4331_s1 + $0xe0] ss:$12 sps:$4 sm:$0xff]   ;;  %2516 = vmatpush3.bf16.msra.mxu1 %v3041_v25  ;;  %v2991_v28 = vld [vmem:[%s4331_s1 + $0x108] ss:$12 sps:$4 sm:$0xff]   ;;  %v3050_v30 = vld [vmem:[%s4331_s1 + $0xf8] ss:$12 sps:$4 sm:$0xff]  }
   0xb   :  { %817 = vmatpush1.bf16.msra.mxu0 %v2964_v5  ;;  %v3043_v27 = vld [vmem:[%s4331_s1 + $0x20] ss:$12 sps:$4 sm:$0xff]   ;;  %2517 = vmatprep.subr.bf16.mxu1 %v3042_v26  ;;  %v3051_v31 = vld [vmem:[%s4331_s1 + $0x38] ss:$12 sps:$4 sm:$0xff]   ;;  %v3052_v32 = vld [vmem:[%s4331_s1 + $0x110] ss:$12 sps:$4 sm:$0xff]  }
   0xc   :  { %818 = vmatprep.subr.bf16.mxu0 %v2965_v6  ;;  %v2994_v33 = vld [vmem:[%s4331_s1 + $0x120] ss:$12 sps:$4 sm:$0xff]   ;;  %v2995_v34 = vld [vmem:[%s4331_s1 + $0x13c] ss:$12 sps:$4 sm:$0xff]   ;;  %v2997_v37 = vld [vmem:[%s4331_s1 + $0x138] ss:$12 sps:$4 sm:$0xff]  }
   0xd   :  { %v3053_v35 = vld [vmem:[%s4331_s1 + $0x50] ss:$12 sps:$4 sm:$0xff]   ;;  %v3057_v36 = vld [vmem:[%s4331_s1 + $0x128] ss:$12 sps:$4 sm:$0xff]   ;;  %v3059_v40 = vld [vmem:[%s4331_s1 + $0x140] ss:$12 sps:$4 sm:$0xff]  }
   0xe   :  { %2518 = vmatpush3.bf16.msra.mxu1 %v3043_v27  ;;  %v2998_v38 = vld [vmem:[%s4331_s1 + $0x154] ss:$12 sps:$4 sm:$0xff]   ;;  %v3000_v41 = vld [vmem:[%s4331_s1 + $0x150] ss:$12 sps:$4 sm:$0xff]   ;;  %v3001_v42 = vld [vmem:[%s4331_s1 + $0x16c] ss:$12 sps:$4 sm:$0xff]  }
   0xf   :  { %819 = vmatpush1.bf16.msra.mxu0 %v2967_v7  ;;  %2519 = vmatprep.subr.bf16.mxu1 %v3050_v30  ;;  %v3058_v39 = vld [vmem:[%s4331_s1 + $0x68] ss:$12 sps:$4 sm:$0xff]   ;;  %v3060_v43 = vld [vmem:[%s4331_s1 + $0x80] ss:$12 sps:$4 sm:$0xff]   ;;  %v3067_v44 = vld [vmem:[%s4331_s1 + $0x158] ss:$12 sps:$4 sm:$0xff]  }
  0x10   :  { %820 = vmatprep.subr.bf16.mxu0 %v2968_v8  ;;  %v3003_v45 = vld [vmem:[%s4331_s1 + $0x168] ss:$12 sps:$4 sm:$0xff]   ;;  %v3009_v46 = vld [vmem:[%s4331_s1 + $0x184] ss:$12 sps:$4 sm:$0xff]   ;;  %v3004_v48 = vld [vmem:[%s4332_s0] ss:$12 sps:$4 sm:$0xff]  }
  0x11   :  { %v3068_v47 = vld [vmem:[%s4331_s1 + $0x98] ss:$12 sps:$4 sm:$0xff]   ;;  %v3069_v49 = vld [vmem:[%s4331_s1 + $0x170] ss:$12 sps:$4 sm:$0xff]   ;;  %v3007_v50 = vld [vmem:[%s4331_s1 + $0x180] ss:$12 sps:$4 sm:$0xff]  }
  0x12   :  { %2520 = vmatpush3.bf16.msra.mxu1 %v3051_v31  ;;  %v3010_v51 = vld [vmem:[%s4332_s0 + $0x1c] ss:$12 sps:$4 sm:$0xff]   ;;  %v3016_v54 = vld [vmem:[%s4331_s1 + $0x198] ss:$12 sps:$4 sm:$0xff]   ;;  %v3027_v56 = vld [vmem:[%s4331_s1 + $0x1b4] ss:$12 sps:$4 sm:$0xff]  }
  0x13   :  { %821 = vmatpush1.bf16.msra.mxu0 %v2970_v9  ;;  %2521 = vmatprep.subr.bf16.mxu1 %v3052_v32  ;;  %v3018_v52 = vld [vmem:[%s4331_s1 + $0x19c] ss:$12 sps:$4 sm:$0xff]   ;;  %v3012_v55 = vld [vmem:[%s4332_s0 + $0x18] ss:$12 sps:$4 sm:$0xff]   ;;  %v3013_v57 = vld [vmem:[%s4332_s0 + $0x34] ss:$12 sps:$4 sm:$0xff]  }
  0x14   :  { %822 = vmatprep.subr.bf16.mxu0 %v2971_v10  ;;  %v3070_v53 = vld [vmem:[%s4331_s1 + $0xb0] ss:$12 sps:$4 sm:$0xff]   ;;  %v3036_v59 = vld [vmem:[%s4331_s1 + $0x1cc] ss:$12 sps:$4 sm:$0xff]   ;;  %v3034_v60 = vld [vmem:[%s4331_s1 + $0x1c8] ss:$12 sps:$4 sm:$0xff]  }
  0x15   :  { %v3025_v58 = vld [vmem:[%s4331_s1 + $0x1b0] ss:$12 sps:$4 sm:$0xff]   ;;  %v3019_v63 = vld [vmem:[%s4332_s0 + $0x4c] ss:$12 sps:$4 sm:$0xff]   ;;  %v3079_v3 = vld [vmem:[%s4331_s1 + $0x214] ss:$12 sps:$4 sm:$0xff]  }
  0x16   :  { %2522 = vmatpush3.bf16.msra.mxu1 %v3053_v35  ;;  %v3049_v61 = vld [vmem:[%s4331_s1 + $0x1e4] ss:$12 sps:$4 sm:$0xff]   ;;  %v3047_v0 = vld [vmem:[%s4331_s1 + $0x1e0] ss:$12 sps:$4 sm:$0xff]   ;;  %v3066_v1 = vld [vmem:[%s4331_s1 + $0x1fc] ss:$12 sps:$4 sm:$0xff]  }
  0x17   :  { %823 = vmatpush1.bf16.msra.mxu0 %v2973_v11  ;;  %2523 = vmatprep.subr.bf16.mxu1 %v3057_v36  ;;  %v3015_v62 = vld [vmem:[%s4332_s0 + $0x30] ss:$12 sps:$4 sm:$0xff]   ;;  %v3064_v2 = vld [vmem:[%s4331_s1 + $0x1f8] ss:$12 sps:$4 sm:$0xff]   ;;  %v3021_v4 = vld [vmem:[%s4332_s0 + $0x48] ss:$12 sps:$4 sm:$0xff]  }
  0x18   :  { %824 = vmatprep.subr.bf16.mxu0 %v2974_v12  ;;  %v3022_v5 = vld [vmem:[%s4332_s0 + $0x64] ss:$12 sps:$4 sm:$0xff]   ;;  %v3088_v7 = vld [vmem:[%s4331_s1 + $0x22c] ss:$12 sps:$4 sm:$0xff]   ;;  %v3086_v8 = vld [vmem:[%s4331_s1 + $0x228] ss:$12 sps:$4 sm:$0xff]  }
  0x19   :  { %v3077_v6 = vld [vmem:[%s4331_s1 + $0x210] ss:$12 sps:$4 sm:$0xff]   ;;  %v3024_v9 = vld [vmem:[%s4332_s0 + $0x60] ss:$12 sps:$4 sm:$0xff]   ;;  %v3030_v11 = vld [vmem:[%s4332_s0 + $0x78] ss:$12 sps:$4 sm:$0xff]  }
  0x1a   :  { %2524 = vmatpush3.bf16.msra.mxu1 %v3058_v39  ;;  %v3028_v10 = vld [vmem:[%s4332_s0 + $0x7c] ss:$12 sps:$4 sm:$0xff]   ;;  %v3031_v12 = vld [vmem:[%s4332_s0 + $0x94] ss:$12 sps:$4 sm:$0xff]   ;;  %v3074_v32 = vld [vmem:[%s4332_s0 + $0x124] ss:$12 sps:$4 sm:$0xff]  }
  0x1b   :  { %825 = vmatpush1.bf16.msra.mxu0 %v2976_v14  ;;  %2525 = vmatprep.subr.bf16.mxu1 %v3059_v40  ;;  %v3033_v13 = vld [vmem:[%s4332_s0 + $0x90] ss:$12 sps:$4 sm:$0xff]   ;;  %v3037_v14 = vld [vmem:[%s4332_s0 + $0xac] ss:$12 sps:$4 sm:$0xff]   ;;  %v3061_v24 = vld [vmem:[%s4332_s0 + $0xf4] ss:$12 sps:$4 sm:$0xff]  }
  0x1c   :  { %826 = vmatprep.subr.bf16.mxu0 %v2977_v15  ;;  %v3039_v15 = vld [vmem:[%s4332_s0 + $0xa8] ss:$12 sps:$4 sm:$0xff]   ;;  %v3107_v26 = vld [vmem:[%s4331_s1 + $0x200] ss:$12 sps:$4 sm:$0xff]   ;;  %v3063_v27 = vld [vmem:[%s4332_s0 + $0xf0] ss:$12 sps:$4 sm:$0xff]  }
  0x1d   :  { %v3106_v25 = vld [vmem:[%s4331_s1 + $0x1e8] ss:$12 sps:$4 sm:$0xff]   ;;  %v3110_v30 = vld [vmem:[%s4331_s1 + $0x230] ss:$12 sps:$4 sm:$0xff]   ;;  %v3082_v35 = vld [vmem:[%s4332_s0 + $0x138] ss:$12 sps:$4 sm:$0xff]  }
  0x1e   :  { %2526 = vmatpush3.bf16.msra.mxu1 %v3060_v43  ;;  %v3073_v31 = vld [vmem:[%s4332_s0 + $0x108] ss:$12 sps:$4 sm:$0xff]   ;;  %v3244_v40 = vmov 0   ;;  %v3094_v43 = vld [vmem:[%s4332_s0 + $0x38] ss:$12 sps:$4 sm:$0xff]  }
  0x1f   :  { %827 = vmatpush1.bf16.msra.mxu0 %v2979_v16  ;;  %2527 = vmatprep.subr.bf16.mxu1 %v3067_v44  ;;  %v3044_v16 = vld [vmem:[%s4332_s0 + $0xc4] ss:$12 sps:$4 sm:$0xff]   ;;  %v3083_v36 = vld [vmem:[%s4332_s0 + $0x154] ss:$12 sps:$4 sm:$0xff]  }
  0x20   :  { %828 = vmatprep.subr.bf16.mxu0 %v2980_v17  ;;  %v3100_v17 = vld [vmem:[%s4331_s1 + $0x188] ss:$12 sps:$4 sm:$0xff]   ;;  %v3095_v44 = vld [vmem:[%s4332_s0 + $0x50] ss:$12 sps:$4 sm:$0xff]  }
  0x21   :  { %v3091_v39 = vld [vmem:[%s4332_s0 + $0x168] ss:$12 sps:$4 sm:$0xff]  }
  0x22   :  { %2528 = vmatpush3.bf16.msra.mxu1 %v3068_v47  ;;  %v3098_v47 = vld [vmem:[%s4332_s0 + $0x98] ss:$12 sps:$4 sm:$0xff]  }
  0x23   :  { %829 = vmatpush1.bf16.msra.mxu0 %v2982_v18  ;;  %2529 = vmatprep.subr.bf16.mxu1 %v3069_v49  ;;  %v3101_v18 = vld [vmem:[%s4331_s1 + $0x1a0] ss:$12 sps:$4 sm:$0xff]   ;;  %v3102_v49 = vld [vmem:[%s4332_s0 + $0xc8] ss:$12 sps:$4 sm:$0xff]  }
  0x24   :  { %830 = vmatprep.subr.bf16.mxu0 %v2983_v19  ;;  %v3046_v19 = vld [vmem:[%s4332_s0 + $0xc0] ss:$12 sps:$4 sm:$0xff]  }
  0x26   :  { %2530 = vmatpush3.bf16.msra.mxu1 %v3070_v53  ;;  %v3112_v53 = vld [vmem:[%s4332_s0 + $0x128] ss:$12 sps:$4 sm:$0xff]  }
  0x27   :  { %831 = vmatpush1.bf16.msra.mxu0 %v2985_v20  ;;  %2715 = vmatprep.subr.bf16.mxu1 %v3100_v17  ;;  %v3054_v20 = vld [vmem:[%s4332_s0 + $0xdc] ss:$12 sps:$4 sm:$0xff]  }
  0x28   :  { %832 = vmatprep.subr.bf16.mxu0 %v2986_v21  ;;  %v3103_v21 = vld [vmem:[%s4331_s1 + $0x1b8] ss:$12 sps:$4 sm:$0xff]  }
  0x29   :  { %1231 = vmatmul.mubr.bf16.vlgmr.msra.gmra.mrb[0].mxu1 %v3004_v48 }
  0x2a   :  { %1238 = vmatprep.mubr.bf16.mxu1 %v3010_v51  ;;  %2716 = vmatpush3.bf16.msra.mxu1 %v3100_v17 }
  0x2b   :  { %833 = vmatpush1.bf16.msra.mxu0 %v2988_v22  ;;  %2717 = vmatprep.subr.bf16.mxu1 %v3101_v18  ;;  %v3104_v22 = vld [vmem:[%s4331_s1 + $0x1d0] ss:$12 sps:$4 sm:$0xff]  }
  0x2c   :  { %834 = vmatprep.subr.bf16.mxu0 %v2989_v23  ;;  %v3056_v23 = vld [vmem:[%s4332_s0 + $0xd8] ss:$12 sps:$4 sm:$0xff]  }
  0x2e   :  { %2718 = vmatpush3.bf16.msra.mxu1 %v3101_v18 }
  0x2f   :  { %835 = vmatpush1.bf16.msra.mxu0 %v2991_v28  ;;  %2719 = vmatprep.subr.bf16.mxu1 %v3103_v21  ;;  %v3071_v28 = vld [vmem:[%s4332_s0 + $0x10c] ss:$12 sps:$4 sm:$0xff]  }
  0x30   :  { %836 = vmatprep.subr.bf16.mxu0 %v2992_v29  ;;  %v3109_v29 = vld [vmem:[%s4331_s1 + $0x218] ss:$12 sps:$4 sm:$0xff]  }
  0x31   :  { %1239 = vmatmul.mubr.bf16.gmra.mrb[4].mxu1 %v3012_v55 }
  0x32   :  { %1246 = vmatprep.mubr.bf16.mxu1 %v3013_v57  ;;  %2720 = vmatpush3.bf16.msra.mxu1 %v3103_v21 }
  0x33   :  { %837 = vmatpush1.bf16.msra.mxu0 %v2994_v33  ;;  %2721 = vmatprep.subr.bf16.mxu1 %v3104_v22  ;;  %v3076_v33 = vld [vmem:[%s4332_s0 + $0x120] ss:$12 sps:$4 sm:$0xff]  }
  0x34   :  { %838 = vmatprep.subr.bf16.mxu0 %v2995_v34  ;;  %v3080_v34 = vld [vmem:[%s4332_s0 + $0x13c] ss:$12 sps:$4 sm:$0xff]  }
  0x36   :  { %2722 = vmatpush3.bf16.msra.mxu1 %v3104_v22 }
  0x37   :  { %839 = vmatpush1.bf16.msra.mxu0 %v2997_v37  ;;  %2723 = vmatprep.subr.bf16.mxu1 %v3106_v25  ;;  %v3085_v37 = vld [vmem:[%s4332_s0 + $0x150] ss:$12 sps:$4 sm:$0xff]  }
  0x38   :  { %840 = vmatprep.subr.bf16.mxu0 %v2998_v38  ;;  %v3089_v38 = vld [vmem:[%s4332_s0 + $0x16c] ss:$12 sps:$4 sm:$0xff]  }
  0x39   :  { %1247 = vmatmul.mubr.bf16.gmra.mrb[8].mxu1 %v3015_v62 }
  0x3a   :  { %1254 = vmatprep.mubr.bf16.mxu1 %v3019_v63  ;;  %2724 = vmatpush3.bf16.msra.mxu1 %v3106_v25 }
  0x3b   :  { %841 = vmatpush1.bf16.msra.mxu0 %v3000_v41  ;;  %2725 = vmatprep.subr.bf16.mxu1 %v3107_v26  ;;  %v3092_v41 = vld [vmem:[%s4332_s0 + $0x8] ss:$12 sps:$4 sm:$0xff]  }
  0x3c   :  { %842 = vmatprep.subr.bf16.mxu0 %v3001_v42  ;;  %v3093_v42 = vld [vmem:[%s4332_s0 + $0x20] ss:$12 sps:$4 sm:$0xff]  }
  0x3e   :  { %2726 = vmatpush3.bf16.msra.mxu1 %v3107_v26 }
  0x3f   :  { %843 = vmatpush1.bf16.msra.mxu0 %v3003_v45  ;;  %2727 = vmatprep.subr.bf16.mxu1 %v3109_v29  ;;  %v3096_v45 = vld [vmem:[%s4332_s0 + $0x68] ss:$12 sps:$4 sm:$0xff]  }
  0x40   :  { %1005 = vmatprep.subr.bf16.mxu0 %v3009_v46  ;;  %v3097_v46 = vld [vmem:[%s4332_s0 + $0x80] ss:$12 sps:$4 sm:$0xff]  }
  0x41   :  { %1255 = vmatmul.mubr.bf16.gmra.mrb[12].mxu1 %v3021_v4 }
  0x42   :  { %845 = vmatmul.mubr.bf16.vlgmr.msra.gmra.mrb[0].mxu0 %v3004_v48  ;;  %1262 = vmatprep.mubr.bf16.mxu1 %v3022_v5  ;;  %v3099_v48 = vld [vmem:[%s4332_s0 + $0xb0] ss:$12 sps:$4 sm:$0xff]  }
  0x43   :  { %1006 = vmatpush1.bf16.msra.mxu0 %v3007_v50  ;;  %854 = vmatprep.mubr.bf16.mxu0 %v3010_v51  ;;  %v3105_v50 = vld [vmem:[%s4332_s0 + $0xe0] ss:$12 sps:$4 sm:$0xff]   ;;  %v3108_v51 = vld [vmem:[%s4332_s0 + $0xf8] ss:$12 sps:$4 sm:$0xff]  }
  0x44   :  { %1007 = vmatprep.subr.bf16.mxu0 %v3018_v52  ;;  %2728 = vmatpush3.bf16.msra.mxu1 %v3109_v29  ;;  %v3111_v52 = vld [vmem:[%s4332_s0 + $0x110] ss:$12 sps:$4 sm:$0xff]  }
  0x45   :  { %2729 = vmatprep.subr.bf16.mxu1 %v3110_v30 }
  0x47   :  { %1008 = vmatpush1.bf16.msra.mxu0 %v3016_v54  ;;  %v3113_v54 = vld [vmem:[%s4332_s0 + $0x140] ss:$12 sps:$4 sm:$0xff]  }
  0x48   :  { %1009 = vmatprep.subr.bf16.mxu0 %v3027_v56  ;;  %2730 = vmatpush3.bf16.msra.mxu1 %v3110_v30  ;;  %v3115_v56 = vld [vmem:[%s4332_s0 + $0x170] ss:$12 sps:$4 sm:$0xff]  }
  0x49   :  { %1263 = vmatmul.mubr.bf16.gmra.mrb[16].mxu1 %v3024_v9 }
  0x4a   :  { %855 = vmatmul.mubr.bf16.gmra.mrb[4].mxu0 %v3012_v55  ;;  %1270 = vmatprep.mubr.bf16.mxu1 %v3028_v10  ;;  %v3114_v55 = vld [vmem:[%s4332_s0 + $0x158] ss:$12 sps:$4 sm:$0xff]  }
  0x4b   :  { %864 = vmatprep.mubr.bf16.mxu0 %v3013_v57  ;;  %1010 = vmatpush1.bf16.msra.mxu0 %v3025_v58 }
  0x4c   :  { %1011 = vmatprep.subr.bf16.mxu0 %v3036_v59 }
  0x4f   :  { %1012 = vmatpush1.bf16.msra.mxu0 %v3034_v60 }
  0x50   :  { %1013 = vmatprep.subr.bf16.mxu0 %v3049_v61 }
  0x51   :  { %1271 = vmatmul.mubr.bf16.gmra.mrb[20].mxu1 %v3030_v11 }
  0x52   :  { %865 = vmatmul.mubr.bf16.gmra.mrb[8].mxu0 %v3015_v62  ;;  %1278 = vmatprep.mubr.bf16.mxu1 %v3031_v12 }
  0x53   :  { %874 = vmatprep.mubr.bf16.mxu0 %v3019_v63  ;;  %1014 = vmatpush1.bf16.msra.mxu0 %v3047_v0 }
  0x54   :  { %1015 = vmatprep.subr.bf16.mxu0 %v3066_v1 }
  0x57   :  { %1016 = vmatpush1.bf16.msra.mxu0 %v3064_v2 }
  0x58   :  { %1017 = vmatprep.subr.bf16.mxu0 %v3079_v3 }
  0x59   :  { %1279 = vmatmul.mubr.bf16.gmra.mrb[24].mxu1 %v3033_v13 }
  0x5a   :  { %875 = vmatmul.mubr.bf16.gmra.mrb[12].mxu0 %v3021_v4  ;;  %1286 = vmatprep.mubr.bf16.mxu1 %v3037_v14 }
  0x5b   :  { %884 = vmatprep.mubr.bf16.mxu0 %v3022_v5  ;;  %1018 = vmatpush1.bf16.msra.mxu0 %v3077_v6 }
  0x5c   :  { %1019 = vmatprep.subr.bf16.mxu0 %v3088_v7 }
  0x5f   :  { %1020 = vmatpush1.bf16.msra.mxu0 %v3086_v8 }
  0x61   :  { %1287 = vmatmul.mubr.bf16.gmra.mrb[28].mxu1 %v3039_v15 }
  0x62   :  { %885 = vmatmul.mubr.bf16.gmra.mrb[16].mxu0 %v3024_v9  ;;  %1294 = vmatprep.mubr.bf16.mxu1 %v3044_v16 }
  0x63   :  { %894 = vmatprep.mubr.bf16.mxu0 %v3028_v10 }
  0x69   :  { %1295 = vmatmul.mubr.bf16.gmra.mrb[32].mxu1 %v3046_v19 }
  0x6a   :  { %895 = vmatmul.mubr.bf16.gmra.mrb[20].mxu0 %v3030_v11  ;;  %1302 = vmatprep.mubr.bf16.mxu1 %v3054_v20 }
  0x6b   :  { %904 = vmatprep.mubr.bf16.mxu0 %v3031_v12 }
  0x71   :  { %1303 = vmatmul.mubr.bf16.gmra.mrb[36].mxu1 %v3056_v23 }
  0x72   :  { %905 = vmatmul.mubr.bf16.gmra.mrb[24].mxu0 %v3033_v13  ;;  %1310 = vmatprep.mubr.bf16.mxu1 %v3061_v24 }
  0x73   :  { %914 = vmatprep.mubr.bf16.mxu0 %v3037_v14 }
  0x79   :  { %1311 = vmatmul.mubr.bf16.gmra.mrb[40].mxu1 %v3063_v27 }
  0x7a   :  { %915 = vmatmul.mubr.bf16.gmra.mrb[28].mxu0 %v3039_v15  ;;  %1318 = vmatprep.mubr.bf16.mxu1 %v3071_v28 }
  0x7b   :  { %924 = vmatprep.mubr.bf16.mxu0 %v3044_v16 }
  0x81   :  { %1319 = vmatmul.mubr.bf16.gmra.mrb[44].mxu1 %v3073_v31 }
  0x82   :  { %925 = vmatmul.mubr.bf16.gmra.mrb[32].mxu0 %v3046_v19  ;;  %1326 = vmatprep.mubr.bf16.mxu1 %v3074_v32 }
  0x83   :  { %934 = vmatprep.mubr.bf16.mxu0 %v3054_v20 }
  0x89   :  { %1327 = vmatmul.mubr.bf16.gmra.mrb[48].mxu1 %v3076_v33 }
  0x8a   :  { %935 = vmatmul.mubr.bf16.gmra.mrb[36].mxu0 %v3056_v23  ;;  %1334 = vmatprep.mubr.bf16.mxu1 %v3080_v34 }
  0x8b   :  { %944 = vmatprep.mubr.bf16.mxu0 %v3061_v24 }
  0x91   :  { %1335 = vmatmul.mubr.bf16.gmra.mrb[52].mxu1 %v3082_v35 }
  0x92   :  { %945 = vmatmul.mubr.bf16.gmra.mrb[40].mxu0 %v3063_v27  ;;  %1342 = vmatprep.mubr.bf16.mxu1 %v3083_v36 }
  0x93   :  { %954 = vmatprep.mubr.bf16.mxu0 %v3071_v28 }
  0x99   :  { %1343 = vmatmul.mubr.bf16.gmra.mrb[56].mxu1 %v3085_v37 }
  0x9a   :  { %955 = vmatmul.mubr.bf16.gmra.mrb[44].mxu0 %v3073_v31  ;;  %1350 = vmatprep.mubr.bf16.mxu1 %v3089_v38 }
  0x9b   :  { %964 = vmatprep.mubr.bf16.mxu0 %v3074_v32 }
  0xa1   :  { %1351 = vmatmul.mubr.bf16.gmra.mrb[60].mxu1 %v3091_v39 }
  0xa2   :  { %965 = vmatmul.mubr.bf16.gmra.mrb[48].mxu0 %v3076_v33  ;;  %2731 = vmatprep.mubr.bf16.mxu1 %v3092_v41 }
  0xa3   :  { %974 = vmatprep.mubr.bf16.mxu0 %v3080_v34 }
  0xa9   :  { %2732 = vmatmul.mubr.bf16.vlgmr.msra.gmra.mrb[64].mxu1 %v3093_v42 }
  0xaa   :  { %975 = vmatmul.mubr.bf16.gmra.mrb[52].mxu0 %v3082_v35  ;;  %2735 = vmatprep.mubr.bf16.mxu1 %v3094_v43 }
  0xab   :  { %984 = vmatprep.mubr.bf16.mxu0 %v3083_v36 }
  0xb1   :  { %2736 = vmatmul.mubr.bf16.gmra.mrb[68].mxu1 %v3095_v44 }
  0xb2   :  { %985 = vmatmul.mubr.bf16.gmra.mrb[56].mxu0 %v3085_v37  ;;  %2739 = vmatprep.mubr.bf16.mxu1 %v3096_v45 }
  0xb3   :  { %994 = vmatprep.mubr.bf16.mxu0 %v3089_v38 }
  0xb9   :  { %2740 = vmatmul.mubr.bf16.gmra.mrb[72].mxu1 %v3097_v46 }
  0xba   :  { %995 = vmatmul.mubr.bf16.gmra.mrb[60].mxu0 %v3091_v39  ;;  %2743 = vmatprep.mubr.bf16.mxu1 %v3098_v47 }
  0xbb   :  { %1037 = vmatprep.mubr.bf16.mxu0 %v3244_v40 }
  0xc1   :  { %2744 = vmatmul.mubr.bf16.gmra.mrb[76].mxu1 %v3099_v48 }
  0xc2   :  { %1038 = vmatmul.mubr.bf16.vlgmr.msra.gmra.mrb[0].mxu0 %v3092_v41  ;;  %2747 = vmatprep.mubr.bf16.mxu1 %v3102_v49 }
  0xc3   :  { %1047 = vmatprep.mubr.bf16.mxu0 %v3244_v40 }
  0xc9   :  { %2748 = vmatmul.mubr.bf16.gmra.mrb[80].mxu1 %v3105_v50 }
  0xca   :  { %1048 = vmatmul.mubr.bf16.gmra.mrb[4].mxu0 %v3093_v42  ;;  %2751 = vmatprep.mubr.bf16.mxu1 %v3108_v51 }
  0xcb   :  { %1057 = vmatprep.mubr.bf16.mxu0 %v3244_v40 }
  0xd1   :  { %2752 = vmatmul.mubr.bf16.gmra.mrb[84].mxu1 %v3111_v52 }
  0xd2   :  { %1058 = vmatmul.mubr.bf16.gmra.mrb[8].mxu0 %v3094_v43  ;;  %2755 = vmatprep.mubr.bf16.mxu1 %v3112_v53 }
  0xd3   :  { %1067 = vmatprep.mubr.bf16.mxu0 %v3244_v40 }
  0xd9   :  { %2756 = vmatmul.mubr.bf16.gmra.mrb[88].mxu1 %v3113_v54 }
  0xda   :  { %1068 = vmatmul.mubr.bf16.gmra.mrb[12].mxu0 %v3095_v44  ;;  %2759 = vmatprep.mubr.bf16.mxu1 %v3114_v55 }
  0xdb   :  { %1077 = vmatprep.mubr.bf16.mxu0 %v3244_v40 }
  0xe1   :  { %2760 = vmatmul.mubr.bf16.gmra.mrb[92].mxu1 %v3115_v56 }
  0xe2   :  { %1078 = vmatmul.mubr.bf16.gmra.mrb[16].mxu0 %v3096_v45 }
  0xe3   :  { %1087 = vmatprep.mubr.bf16.mxu0 %v3244_v40 }
  0xea   :  { %1088 = vmatmul.mubr.bf16.gmra.mrb[20].mxu0 %v3097_v46 }
  0xeb   :  { %1097 = vmatprep.mubr.bf16.mxu0 %v3244_v40 }
  0xf2   :  { %1098 = vmatmul.mubr.bf16.gmra.mrb[24].mxu0 %v3098_v47 }
  0xf3   :  { %1107 = vmatprep.mubr.bf16.mxu0 %v3244_v40 }
  0xfa   :  { %1108 = vmatmul.mubr.bf16.gmra.mrb[28].mxu0 %v3099_v48 }
  0xfb   :  { %1117 = vmatprep.mubr.bf16.mxu0 %v3244_v40 }
  0xfc   :  { %v2531_v57 = vpop.f32.mrb[0].mxu1 }
  0xfd   :  { %v2532_v58 = vpop.f32.mrb[1].mxu1 }
  0xfe   :  { %v3635_v59 = vadd.f32 %v2532_v58, %v2531_v57  ;;  %v2534_v60 = vpop.f32.mrb[2].mxu1 }
  0xff   :  { %v2535_v61 = vpop.f32.mrb[3].mxu1 }
 0x100   :  { %v3637_v63 = vadd.f32 %v2535_v61, %v2534_v60 }
 0x102   :  { %1118 = vmatmul.mubr.bf16.gmra.mrb[32].mxu0 %v3102_v49 }
 0x103   :  { %1127 = vmatprep.mubr.bf16.mxu0 %v3244_v40 }
 0x104   :  { %v2537_v62 = vpop.f32.mrb[4].mxu1 }
 0x105   :  { %v2538_v0 = vpop.f32.mrb[5].mxu1 }
 0x106   :  { %v3639_v1 = vadd.f32 %v2538_v0, %v2537_v62  ;;  %v2540_v2 = vpop.f32.mrb[6].mxu1 }
 0x107   :  { %v2541_v3 = vpop.f32.mrb[7].mxu1 }
 0x108   :  { %v3642_v4 = vadd.f32 %v2541_v3, %v2540_v2 }
 0x10a   :  { %1128 = vmatmul.mubr.bf16.gmra.mrb[36].mxu0 %v3105_v50 }
 0x10b   :  { %1137 = vmatprep.mubr.bf16.mxu0 %v3244_v40 }
 0x10c   :  { %v2543_v5 = vpop.f32.mrb[8].mxu1 }
 0x10d   :  { %v2544_v6 = vpop.f32.mrb[9].mxu1 }
 0x10e   :  { %v3644_v7 = vadd.f32 %v2544_v6, %v2543_v5  ;;  %v2546_v8 = vpop.f32.mrb[10].mxu1 }
 0x10f   :  { %v2547_v9 = vpop.f32.mrb[11].mxu1 }
 0x110   :  { %v3646_v11 = vadd.f32 %v2547_v9, %v2546_v8 }
 0x112   :  { %1138 = vmatmul.mubr.bf16.gmra.mrb[40].mxu0 %v3108_v51 }
 0x113   :  { %1147 = vmatprep.mubr.bf16.mxu0 %v3244_v40 }
 0x114   :  { %v2549_v10 = vpop.f32.mrb[12].mxu1 }
 0x115   :  { %v2550_v12 = vpop.f32.mrb[13].mxu1 }
 0x116   :  { %v3648_v13 = vadd.f32 %v2550_v12, %v2549_v10  ;;  %v2552_v14 = vpop.f32.mrb[14].mxu1 }
 0x117   :  { %v2553_v15 = vpop.f32.mrb[15].mxu1 }
 0x118   :  { %v3650_v16 = vadd.f32 %v2553_v15, %v2552_v14 }
 0x11a   :  { %1148 = vmatmul.mubr.bf16.gmra.mrb[44].mxu0 %v3111_v52 }
 0x11b   :  { %1157 = vmatprep.mubr.bf16.mxu0 %v3244_v40 }
 0x11c   :  { %v2555_v17 = vpop.f32.mrb[16].mxu1 }
 0x11d   :  { %v2556_v18 = vpop.f32.mrb[17].mxu1 }
 0x11e   :  { %v3652_v19 = vadd.f32 %v2556_v18, %v2555_v17  ;;  %v2558_v20 = vpop.f32.mrb[18].mxu1 }
 0x11f   :  { %v2559_v21 = vpop.f32.mrb[19].mxu1 }
 0x120   :  { %v3654_v22 = vadd.f32 %v2559_v21, %v2558_v20 }
 0x122   :  { %1158 = vmatmul.mubr.bf16.gmra.mrb[48].mxu0 %v3112_v53 }
 0x123   :  { %1167 = vmatprep.mubr.bf16.mxu0 %v3244_v40 }
 0x124   :  { %v2561_v23 = vpop.f32.mrb[20].mxu1 }
 0x125   :  { %v2562_v24 = vpop.f32.mrb[21].mxu1 }
 0x126   :  { %v3656_v25 = vadd.f32 %v2562_v24, %v2561_v23  ;;  %v2564_v26 = vpop.f32.mrb[22].mxu1 }
 0x127   :  { %v2565_v27 = vpop.f32.mrb[23].mxu1 }
 0x128   :  { %v3658_v28 = vadd.f32 %v2565_v27, %v2564_v26 }
 0x12a   :  { %1168 = vmatmul.mubr.bf16.gmra.mrb[52].mxu0 %v3113_v54 }
 0x12b   :  { %1177 = vmatprep.mubr.bf16.mxu0 %v3244_v40 }
 0x12c   :  { %v2567_v29 = vpop.f32.mrb[24].mxu1 }
 0x12d   :  { %v2568_v30 = vpop.f32.mrb[25].mxu1 }
 0x12e   :  { %v3660_v31 = vadd.f32 %v2568_v30, %v2567_v29  ;;  %v2570_v32 = vpop.f32.mrb[26].mxu1 }
 0x12f   :  { %v2571_v33 = vpop.f32.mrb[27].mxu1 }
 0x130   :  { %v3662_v34 = vadd.f32 %v2571_v33, %v2570_v32 }
 0x132   :  { %1178 = vmatmul.mubr.bf16.gmra.mrb[56].mxu0 %v3114_v55 }
 0x133   :  { %1187 = vmatprep.mubr.bf16.mxu0 %v3244_v40 }
 0x134   :  { %v2573_v35 = vpop.f32.mrb[28].mxu1 }
 0x135   :  { %v2574_v36 = vpop.f32.mrb[29].mxu1 }
 0x136   :  { %v3664_v37 = vadd.f32 %v2574_v36, %v2573_v35  ;;  %v2576_v38 = vpop.f32.mrb[30].mxu1 }
 0x137   :  { %v2577_v39 = vpop.f32.mrb[31].mxu1 }
 0x138   :  { %v3666_v40 = vadd.f32 %v2577_v39, %v2576_v38 }
 0x13a   :  { %1188 = vmatmul.mubr.bf16.gmra.mrb[60].mxu0 %v3115_v56 }
 0x13c   :  { %v2579_v41 = vpop.f32.mrb[32].mxu1 }
 0x13d   :  { %v2580_v42 = vpop.f32.mrb[33].mxu1 }
 0x13e   :  { %v3668_v43 = vadd.f32 %v2580_v42, %v2579_v41  ;;  %v2582_v44 = vpop.f32.mrb[34].mxu1 }
 0x13f   :  { %v2583_v45 = vpop.f32.mrb[35].mxu1 }
 0x140   :  { %v3670_v46 = vadd.f32 %v2583_v45, %v2582_v44 }
 0x144   :  { %v2585_v47 = vpop.f32.mrb[36].mxu1 }
 0x145   :  { %v2586_v48 = vpop.f32.mrb[37].mxu1 }
 0x146   :  { %v3672_v49 = vadd.f32 %v2586_v48, %v2585_v47  ;;  %v2588_v50 = vpop.f32.mrb[38].mxu1 }
 0x147   :  { %v2589_v51 = vpop.f32.mrb[39].mxu1 }
 0x148   :  { %v3674_v52 = vadd.f32 %v2589_v51, %v2588_v50 }
 0x14c   :  { %v2591_v53 = vpop.f32.mrb[40].mxu1 }
 0x14d   :  { %v2592_v54 = vpop.f32.mrb[41].mxu1 }
 0x14e   :  { %v3676_v55 = vadd.f32 %v2592_v54, %v2591_v53  ;;  %v2594_v56 = vpop.f32.mrb[42].mxu1 }
 0x14f   :  { %v2595_v57 = vpop.f32.mrb[43].mxu1 }
 0x150   :  { %v3678_v58 = vadd.f32 %v2595_v57, %v2594_v56 }
 0x154   :  { %v2597_v60 = vpop.f32.mrb[44].mxu1 }
 0x155   :  { %v2598_v61 = vpop.f32.mrb[45].mxu1 }
 0x156   :  { %v3680_v62 = vadd.f32 %v2598_v61, %v2597_v60  ;;  %v2600_v0 = vpop.f32.mrb[46].mxu1 }
 0x157   :  { %v2601_v2 = vpop.f32.mrb[47].mxu1 }
 0x158   :  { %v3682_v3 = vadd.f32 %v2601_v2, %v2600_v0 }
 0x15c   :  { %v2603_v5 = vpop.f32.mrb[48].mxu1 }
 0x15d   :  { %v2604_v6 = vpop.f32.mrb[49].mxu1 }
 0x15e   :  { %v3684_v8 = vadd.f32 %v2604_v6, %v2603_v5  ;;  %v2606_v9 = vpop.f32.mrb[50].mxu1 }
 0x15f   :  { %v2607_v10 = vpop.f32.mrb[51].mxu1 }
 0x160   :  { %v3686_v12 = vadd.f32 %v2607_v10, %v2606_v9 }
 0x164   :  { %v2609_v14 = vpop.f32.mrb[52].mxu1 }
 0x165   :  { %v2610_v15 = vpop.f32.mrb[53].mxu1 }
 0x166   :  { %v3688_v17 = vadd.f32 %v2610_v15, %v2609_v14  ;;  %v2612_v18 = vpop.f32.mrb[54].mxu1 }
 0x167   :  { %v2613_v20 = vpop.f32.mrb[55].mxu1 }
 0x168   :  { %v3690_v21 = vadd.f32 %v2613_v20, %v2612_v18 }
 0x16c   :  { %v2615_v23 = vpop.f32.mrb[56].mxu1 }
 0x16d   :  { %v2616_v24 = vpop.f32.mrb[57].mxu1 }
 0x16e   :  { %v3692_v26 = vadd.f32 %v2616_v24, %v2615_v23  ;;  %v2618_v27 = vpop.f32.mrb[58].mxu1 }
 0x16f   :  { %v2619_v29 = vpop.f32.mrb[59].mxu1 }
 0x170   :  { %v3694_v30 = vadd.f32 %v2619_v29, %v2618_v27 }
 0x174   :  { %v2621_v32 = vpop.f32.mrb[60].mxu1 }
 0x175   :  { %v2622_v33 = vpop.f32.mrb[61].mxu1 }
 0x176   :  { %v3696_v36 = vadd.f32 %v2622_v33, %v2621_v32  ;;  %v2624_v38 = vpop.f32.mrb[62].mxu1 }
 0x177   :  { %v2625_v41 = vpop.f32.mrb[63].mxu1 }
 0x178   :  { %v3698_v44 = vadd.f32 %v2625_v41, %v2624_v38 }
 0x17c   :  { %v2733_v50 = vpop.f32.mrb[64].mxu1 }
 0x17d   :  { %v1402_v51 = vadd.f32 %v2733_v50, %v3639_v1  ;;  %v1393_v53 = vpop.f32.mrb[65].mxu1 }
 0x17e   :  { %v1394_v56 = vadd.f32 %v3635_v59, %v1393_v53  ;;  %v2734_v57 = vpop.f32.mrb[66].mxu1 }
 0x17f   :  { %v1405_v61 = vadd.f32 %v2734_v57, %v3642_v4  ;;  %v1396_v0 = vpop.f32.mrb[67].mxu1 }
 0x180   :  { %v1397_v5 = vadd.f32 %v3637_v63, %v1396_v0 }
 0x181   :  { %v2150_v10 = vpack.c.bf16 %v1405_v61, %v1402_v51 }
 0x182   :  { %v2149_v14 = vpack.c.bf16 %v1397_v5, %v1394_v56 }
 0x184   :  { %2827 = vmatprep.subr.bf16.mxu0 %v2149_v14  ;;  %v2737_v59 = vpop.f32.mrb[68].mxu1 }
 0x185   :  { %2828 = vmatpush3.bf16.msra.mxu0 %v2149_v14  ;;  %v1418_v15 = vadd.f32 %v2737_v59, %v3648_v13  ;;  %v1409_v4 = vpop.f32.mrb[69].mxu1 }
 0x186   :  { %2829 = vmatprep.subr.bf16.mxu0 %v2150_v10  ;;  %v1410_v63 = vadd.f32 %v3644_v7, %v1409_v4  ;;  %v2738_v20 = vpop.f32.mrb[70].mxu1 }
 0x187   :  { %v1421_v24 = vadd.f32 %v2738_v20, %v3650_v16  ;;  %v1412_v27 = vpop.f32.mrb[71].mxu1 }
 0x188   :  { %v1413_v32 = vadd.f32 %v3646_v11, %v1412_v27 }
 0x189   :  { %2830 = vmatpush3.bf16.msra.mxu0 %v2150_v10  ;;  %v2152_v38 = vpack.c.bf16 %v1421_v24, %v1418_v15 }
 0x18c   :  { %v2741_v7 = vpop.f32.mrb[72].mxu1 }
 0x18d   :  { %v1434_v16 = vadd.f32 %v2741_v7, %v3656_v25  ;;  %v1425_v41 = vpop.f32.mrb[73].mxu1 }
 0x18e   :  { %v1426_v11 = vadd.f32 %v3652_v19, %v1425_v41 }
 0x195   :  { %v1039_v35 = vpop.f32.mrb[0].mxu0 }
 0x196   :  { %v1041_v39 = vpop.f32.mrb[1].mxu0 }
 0x197   :  { %v1043_v42 = vpop.f32.mrb[2].mxu0 }
 0x198   :  { %v1536_v45 = vpack.c.bf16 %v1043_v42, %v1039_v35  ;;  %v1045_v47 = vpop.f32.mrb[3].mxu0 }
 0x199   :  { %v1520_v48 = vpack.c.bf16 %v1045_v47, %v1041_v39  ;;  %v2151_v39 = vpack.c.bf16 %v1413_v32, %v1410_v63 }
 0x19a   :  { %2763 = vmatprep.subr.bf16.mxu1 %v1536_v45 }
 0x19b   :  { %2764 = vmatpush3.bf16.xpose.msra.mxu1 %v1536_v45  ;;  %2779 = vmatprep.mubr.bf16.mxu1 %v1520_v48  ;;  %v2742_v45 = vpop.f32.mrb[74].mxu1 }
 0x19c   :  { %2831 = vmatprep.subr.bf16.mxu0 %v2151_v39  ;;  %v1437_v48 = vadd.f32 %v2742_v45, %v3658_v28  ;;  %v1428_v50 = vpop.f32.mrb[75].mxu1 }
 0x19d   :  { %v1049_v54 = vpop.f32.mrb[4].mxu0  ;;  %2832 = vmatpush3.bf16.msra.mxu0 %v2151_v39  ;;  %v1429_v53 = vadd.f32 %v3654_v22, %v1428_v50  ;;  %v2745_v19 = vpop.f32.mrb[76].mxu1 }
 0x19e   :  { %v3702_v60 = vpop.f32.mrb[5].mxu0  ;;  %2833 = vmatprep.subr.bf16.mxu0 %v2152_v38  ;;  %v2154_v57 = vpack.c.bf16 %v1437_v48, %v1434_v16  ;;  %v1450_v28 = vadd.f32 %v2745_v19, %v3664_v37  ;;  %v1441_v0 = vpop.f32.mrb[77].mxu1 }
 0x19f   :  { %v1053_v2 = vpop.f32.mrb[6].mxu0  ;;  %v2153_v61 = vpack.c.bf16 %v1429_v53, %v1426_v11  ;;  %v1442_v22 = vadd.f32 %v3660_v31, %v1441_v0  ;;  %v2746_v5 = vpop.f32.mrb[78].mxu1 }
 0x1a0   :  { %v1537_v6 = vpack.c.bf16 %v1053_v2, %v1049_v54  ;;  %v3706_v9 = vpop.f32.mrb[7].mxu0  ;;  %v1453_v10 = vadd.f32 %v2746_v5, %v3666_v40  ;;  %v1444_v14 = vpop.f32.mrb[79].mxu1 }
 0x1a1   :  { %v1521_v1 = vpack.c.bf16 %v3706_v9, %v3702_v60  ;;  %2834 = vmatpush3.bf16.msra.mxu0 %v2152_v38  ;;  %v1445_v15 = vadd.f32 %v3662_v34, %v1444_v14  ;;  %v2749_v31 = vpop.f32.mrb[80].mxu1 }
 0x1a2   :  { %2765 = vmatprep.subr.bf16.mxu1 %v1537_v6  ;;  %2835 = vmatprep.subr.bf16.mxu0 %v2153_v61  ;;  %v2156_v63 = vpack.c.bf16 %v1453_v10, %v1450_v28  ;;  %v1466_v40 = vadd.f32 %v2749_v31, %v3672_v49  ;;  %v1457_v24 = vpop.f32.mrb[81].mxu1 }
 0x1a3   :  { %2766 = vmatpush3.bf16.xpose.msra.mxu1 %v1537_v6  ;;  %v2155_v20 = vpack.c.bf16 %v1445_v15, %v1442_v22  ;;  %v1458_v34 = vadd.f32 %v3668_v43, %v1457_v24 }
 0x1a5   :  { %v1059_v18 = vpop.f32.mrb[8].mxu0  ;;  %2836 = vmatpush3.bf16.msra.mxu0 %v2153_v61 }
 0x1a6   :  { %v3712_v23 = vpop.f32.mrb[9].mxu0  ;;  %2837 = vmatprep.subr.bf16.mxu0 %v2154_v57 }
 0x1a7   :  { %v1063_v29 = vpop.f32.mrb[10].mxu0 }
 0x1a8   :  { %v1538_v33 = vpack.c.bf16 %v1063_v29, %v1059_v18  ;;  %v3716_v35 = vpop.f32.mrb[11].mxu0  ;;  %v2750_v29 = vpop.f32.mrb[82].mxu1 }
 0x1a9   :  { %v1522_v13 = vpack.c.bf16 %v3716_v35, %v3712_v23  ;;  %2838 = vmatpush3.bf16.msra.mxu0 %v2154_v57  ;;  %v1460_v38 = vpop.f32.mrb[83].mxu1 }
 0x1aa   :  { %2767 = vmatprep.subr.bf16.mxu1 %v1538_v33  ;;  %2839 = vmatprep.subr.bf16.mxu0 %v2155_v20  ;;  %v1461_v7 = vadd.f32 %v3670_v46, %v1460_v38  ;;  %v2753_v43 = vpop.f32.mrb[84].mxu1 }
 0x1ab   :  { %2768 = vmatpush3.bf16.xpose.msra.mxu1 %v1538_v33  ;;  %v1469_v33 = vadd.f32 %v2750_v29, %v3674_v52  ;;  %v1482_v52 = vadd.f32 %v2753_v43, %v3680_v62  ;;  %v1473_v45 = vpop.f32.mrb[85].mxu1 }
 0x1ac   :  { %v3752_v11 = vpack.c.bf16 %v1461_v7, %v1458_v34  ;;  %v1474_v46 = vadd.f32 %v3676_v55, %v1473_v45  ;;  %v2754_v50 = vpop.f32.mrb[86].mxu1 }
 0x1ad   :  { %v1069_v42 = vpop.f32.mrb[12].mxu0  ;;  %2840 = vmatpush3.bf16.msra.mxu0 %v2155_v20  ;;  %v1485_v53 = vadd.f32 %v2754_v50, %v3682_v3 }
 0x1ae   :  { %v3722_v47 = vpop.f32.mrb[13].mxu0  ;;  %2841 = vmatprep.subr.bf16.mxu0 %v2156_v63 }
 0x1af   :  { %v1073_v51 = vpop.f32.mrb[14].mxu0  ;;  %v3760_v0 = vpack.c.bf16 %v1485_v53, %v1482_v52 }
 0x1b0   :  { %v1539_v54 = vpack.c.bf16 %v1073_v51, %v1069_v42  ;;  %v3726_v56 = vpop.f32.mrb[15].mxu0  ;;  %v3748_v42 = vpack.c.bf16 %v1469_v33, %v1466_v40 }
 0x1b1   :  { %v1523_v25 = vpack.c.bf16 %v3726_v56, %v3722_v47  ;;  %2842 = vmatpush3.bf16.msra.mxu0 %v2156_v63 }
 0x1b2   :  { %2769 = vmatprep.subr.bf16.mxu1 %v1539_v54 }
 0x1b3   :  { %2770 = vmatpush3.bf16.xpose.msra.mxu1 %v1539_v54  ;;  %v1476_v54 = vpop.f32.mrb[87].mxu1 }
 0x1b4   :  { %v1477_v61 = vadd.f32 %v3678_v58, %v1476_v54  ;;  %v2757_v55 = vpop.f32.mrb[88].mxu1 }
 0x1b5   :  { %v1079_v2 = vpop.f32.mrb[16].mxu0  ;;  %v1498_v22 = vadd.f32 %v2757_v55, %v3688_v17  ;;  %v1489_v5 = vpop.f32.mrb[89].mxu1 }
 0x1b6   :  { %v3732_v6 = vpop.f32.mrb[17].mxu0  ;;  %v3763_v62 = vpack.c.bf16 %v1477_v61, %v1474_v46  ;;  %v1490_v3 = vadd.f32 %v3684_v8, %v1489_v5  ;;  %v2758_v14 = vpop.f32.mrb[90].mxu1 }
 0x1b7   :  { %v1083_v59 = vpop.f32.mrb[18].mxu0  ;;  %v1501_v58 = vadd.f32 %v2758_v14, %v3690_v21  ;;  %v1492_v15 = vpop.f32.mrb[91].mxu1 }
 0x1b8   :  { %v1540_v4 = vpack.c.bf16 %v1083_v59, %v1079_v2  ;;  %v3736_v18 = vpop.f32.mrb[19].mxu0  ;;  %v1493_v63 = vadd.f32 %v3686_v12, %v1492_v15  ;;  %v2761_v17 = vpop.f32.mrb[92].mxu1 }
 0x1b9   :  { %v1524_v37 = vpack.c.bf16 %v3736_v18, %v3732_v6  ;;  %v3769_v40 = vpack.c.bf16 %v1501_v58, %v1498_v22  ;;  %v1514_v8 = vadd.f32 %v2761_v17, %v3696_v36  ;;  %v1505_v34 = vpop.f32.mrb[93].mxu1 }
 0x1ba   :  { %2771 = vmatprep.subr.bf16.mxu1 %v1540_v4  ;;  %v1506_v21 = vadd.f32 %v3692_v26, %v1505_v34  ;;  %v2762_v33 = vpop.f32.mrb[94].mxu1 }
 0x1bb   :  { %2772 = vmatpush3.bf16.xpose.msra.mxu1 %v1540_v4  ;;  %v1517_v12 = vadd.f32 %v2762_v33, %v3698_v44 }
 0x1bd   :  { %v1089_v27 = vpop.f32.mrb[20].mxu0  ;;  %v3777_v45 = vpack.c.bf16 %v1517_v12, %v1514_v8 }
 0x1be   :  { %v3742_v32 = vpop.f32.mrb[21].mxu0 }
 0x1bf   :  { %v1093_v39 = vpop.f32.mrb[22].mxu0 }
 0x1c0   :  { %v1541_v16 = vpack.c.bf16 %v1093_v39, %v1089_v27  ;;  %v3746_v41 = vpop.f32.mrb[23].mxu0  ;;  %v3771_v27 = vpack.c.bf16 %v1493_v63, %v1490_v3  ;;  %v1508_v39 = vpop.f32.mrb[95].mxu1 }
 0x1c1   :  { %v1525_v49 = vpack.c.bf16 %v3746_v41, %v3742_v32 }
 0x1c2   :  { %2773 = vmatprep.subr.bf16.mxu1 %v1541_v16 }
 0x1c3   :  { %2774 = vmatpush3.bf16.xpose.msra.mxu1 %v1541_v16  ;;  %v1509_v16 = vadd.f32 %v3694_v30, %v1508_v39 }
 0x1c5   :  { %v1099_v48 = vpop.f32.mrb[24].mxu0  ;;  %v3779_v46 = vpack.c.bf16 %v1509_v16, %v1506_v21 }
 0x1c6   :  { %v3756_v51 = vpop.f32.mrb[25].mxu0 }
 0x1c7   :  { %v1103_v57 = vpop.f32.mrb[26].mxu0 }
 0x1c8   :  { %v1542_v19 = vpack.c.bf16 %v1103_v57, %v1099_v48  ;;  %v1105_v28 = vpop.f32.mrb[27].mxu0 }
 0x1c9   :  { %v1526_v2 = vpack.c.bf16 %v1105_v28, %v3756_v51 }
 0x1ca   :  { %2775 = vmatprep.subr.bf16.mxu1 %v1542_v19 }
 0x1cb   :  { %2776 = vmatpush3.bf16.xpose.msra.mxu1 %v1542_v19 }
 0x1cd   :  { %v1109_v10 = vpop.f32.mrb[28].mxu0 }
 0x1ce   :  { %v1111_v59 = vpop.f32.mrb[29].mxu0 }
 0x1cf   :  { %v1113_v4 = vpop.f32.mrb[30].mxu0 }
 0x1d0   :  { %v1543_v20 = vpack.c.bf16 %v1113_v4, %v1109_v10  ;;  %v1115_v31 = vpop.f32.mrb[31].mxu0 }
 0x1d1   :  { %v1527_v24 = vpack.c.bf16 %v1115_v31, %v1111_v59 }
 0x1d2   :  { %2777 = vmatprep.subr.bf16.mxu1 %v1543_v20 }
 0x1d3   :  { %2778 = vmatpush3.bf16.xpose.msra.mxu1 %v1543_v20 }
 0x1d5   :  { %v1119_v29 = vpop.f32.mrb[32].mxu0 }
 0x1d6   :  { %v1121_v38 = vpop.f32.mrb[33].mxu0 }
 0x1d7   :  { %v1123_v7 = vpop.f32.mrb[34].mxu0 }
 0x1d8   :  { %v1544_v43 = vpack.c.bf16 %v1123_v7, %v1119_v29  ;;  %v1125_v52 = vpop.f32.mrb[35].mxu0 }
 0x1d9   :  { %v1528_v48 = vpack.c.bf16 %v1125_v52, %v1121_v38 }
 0x1da   :  { %2780 = vmatmul.mubr.bf16.vlgmr.msra.gmra.mrb[96].mxu1 %v1521_v1  ;;  %2795 = vmatprep.subr.bf16.mxu1 %v1544_v43 }
 0x1db   :  { %2783 = vmatprep.mubr.bf16.mxu1 %v1522_v13  ;;  %2796 = vmatpush3.bf16.xpose.msra.mxu1 %v1544_v43 }
 0x1dd   :  { %v1129_v26 = vpop.f32.mrb[36].mxu0 }
 0x1de   :  { %v1131_v36 = vpop.f32.mrb[37].mxu0 }
 0x1df   :  { %v1133_v30 = vpop.f32.mrb[38].mxu0 }
 0x1e0   :  { %v1545_v44 = vpack.c.bf16 %v1133_v30, %v1129_v26  ;;  %v1135_v50 = vpop.f32.mrb[39].mxu0 }
 0x1e1   :  { %v1529_v51 = vpack.c.bf16 %v1135_v50, %v1131_v36 }
 0x1e2   :  { %2784 = vmatmul.mubr.bf16.gmra.mrb[100].mxu1 %v1523_v25  ;;  %2797 = vmatprep.subr.bf16.mxu1 %v1545_v44 }
 0x1e3   :  { %2787 = vmatprep.mubr.bf16.mxu1 %v1524_v37  ;;  %2798 = vmatpush3.bf16.xpose.msra.mxu1 %v1545_v44 }
 0x1e5   :  { %v1139_v60 = vpop.f32.mrb[40].mxu0 }
 0x1e6   :  { %v1141_v9 = vpop.f32.mrb[41].mxu0 }
 0x1e7   :  { %v1143_v1 = vpop.f32.mrb[42].mxu0 }
 0x1e8   :  { %v1546_v23 = vpack.c.bf16 %v1143_v1, %v1139_v60  ;;  %v1145_v35 = vpop.f32.mrb[43].mxu0 }
 0x1e9   :  { %v1530_v13 = vpack.c.bf16 %v1145_v35, %v1141_v9 }
 0x1ea   :  { %2788 = vmatmul.mubr.bf16.gmra.mrb[104].mxu1 %v1525_v49  ;;  %2799 = vmatprep.subr.bf16.mxu1 %v1546_v23 }
 0x1eb   :  { %2791 = vmatprep.mubr.bf16.mxu1 %v1526_v2  ;;  %2800 = vmatpush3.bf16.xpose.msra.mxu1 %v1546_v23 }
 0x1ed   :  { %v1149_v47 = vpop.f32.mrb[44].mxu0 }
 0x1ee   :  { %v1151_v56 = vpop.f32.mrb[45].mxu0 }
 0x1ef   :  { %v1153_v25 = vpop.f32.mrb[46].mxu0 }
 0x1f0   :  { %v1547_v53 = vpack.c.bf16 %v1153_v25, %v1149_v47  ;;  %v1155_v6 = vpop.f32.mrb[47].mxu0 }
 0x1f1   :  { %v1531_v18 = vpack.c.bf16 %v1155_v6, %v1151_v56 }
 0x1f2   :  { %2792 = vmatmul.mubr.bf16.gmra.mrb[108].mxu1 %v1527_v24  ;;  %2801 = vmatprep.subr.bf16.mxu1 %v1547_v53 }
 0x1f3   :  { %2802 = vmatpush3.bf16.xpose.msra.mxu1 %v1547_v53  ;;  %2811 = vmatprep.mubr.bf16.mxu1 %v1528_v48 }
 0x1f5   :  { %v1159_v37 = vpop.f32.mrb[48].mxu0 }
 0x1f6   :  { %v1161_v54 = vpop.f32.mrb[49].mxu0 }
 0x1f7   :  { %v1163_v57 = vpop.f32.mrb[50].mxu0 }
 0x1f8   :  { %v1548_v61 = vpack.c.bf16 %v1163_v57, %v1159_v37  ;;  %v1165_v19 = vpop.f32.mrb[51].mxu0 }
 0x1f9   :  { %v1532_v32 = vpack.c.bf16 %v1165_v19, %v1161_v54 }
 0x1fa   :  { %2803 = vmatprep.subr.bf16.mxu1 %v1548_v61 }
 0x1fb   :  { %2804 = vmatpush3.bf16.xpose.msra.mxu1 %v1548_v61 }
 0x1fd   :  { %v1169_v41 = vpop.f32.mrb[52].mxu0 }
 0x1fe   :  { %v1171_v49 = vpop.f32.mrb[53].mxu0 }
 0x1ff   :  { %v1173_v28 = vpop.f32.mrb[54].mxu0 }
 0x200   :  { %v1549_v2 = vpack.c.bf16 %v1173_v28, %v1169_v41  ;;  %v1175_v55 = vpop.f32.mrb[55].mxu0 }
 0x201   :  { %v1533_v22 = vpack.c.bf16 %v1175_v55, %v1171_v49 }
 0x202   :  { %2805 = vmatprep.subr.bf16.mxu1 %v1549_v2 }
 0x203   :  { %2806 = vmatpush3.bf16.xpose.msra.mxu1 %v1549_v2 }
 0x205   :  { %v1179_v5 = vpop.f32.mrb[56].mxu0 }
 0x206   :  { %v1181_v10 = vpop.f32.mrb[57].mxu0 }
 0x207   :  { %v1183_v3 = vpop.f32.mrb[58].mxu0 }
 0x208   :  { %v1550_v14 = vpack.c.bf16 %v1183_v3, %v1179_v5  ;;  %v1185_v59 = vpop.f32.mrb[59].mxu0 }
 0x209   :  { %v1534_v58 = vpack.c.bf16 %v1185_v59, %v1181_v10 }
 0x20a   :  { %2807 = vmatprep.subr.bf16.mxu1 %v1550_v14 }
 0x20b   :  { %2808 = vmatpush3.bf16.xpose.msra.mxu1 %v1550_v14 }
 0x20d   :  { %v1189_v15 = vpop.f32.mrb[60].mxu0 }
 0x20e   :  { %v1191_v4 = vpop.f32.mrb[61].mxu0 }
 0x20f   :  { %v1193_v63 = vpop.f32.mrb[62].mxu0 }
 0x210   :  { %v1551_v20 = vpack.c.bf16 %v1193_v63, %v1189_v15  ;;  %v1195_v31 = vpop.f32.mrb[63].mxu0 }
 0x211   :  { %v1535_v24 = vpack.c.bf16 %v1195_v31, %v1191_v4 }
 0x212   :  { %2809 = vmatprep.subr.bf16.mxu1 %v1551_v20 }
 0x213   :  { %2810 = vmatpush3.bf16.xpose.msra.mxu1 %v1551_v20 }
 0x214   :  { %2859 = vmatprep.subr.bf16.mxu1 %v3752_v11 }
 0x21a   :  { %2812 = vmatmul.mubr.bf16.vlgmr.msra.gmra.mrb[112].mxu1 %v1529_v51 }
 0x21b   :  { %2815 = vmatprep.mubr.bf16.mxu1 %v1530_v13  ;;  %2860 = vmatpush3.bf16.msra.mxu1 %v3752_v11 }
 0x21c   :  { %2861 = vmatprep.subr.bf16.mxu1 %v3748_v42 }
 0x21f   :  { %2862 = vmatpush3.bf16.msra.mxu1 %v3748_v42  ;;  %v1746_v42 = vlaneseq }
 0x220   :  { %2863 = vmatprep.subr.bf16.mxu1 %v3763_v62 }
 0x221   :  { %v3812_v11 = vshrl.u32 %v1746_v42, 7 }
 0x222   :  { %2816 = vmatmul.mubr.bf16.gmra.mrb[116].mxu1 %v1531_v18 }
 0x223   :  { %2819 = vmatprep.mubr.bf16.mxu1 %v1532_v32  ;;  %2864 = vmatpush3.bf16.msra.mxu1 %v3763_v62  ;;  %v3817_v62 = vadd.s32 112, %v3812_v11  ;;  %v3830_v17 = vadd.s32 24, %v3812_v11  ;;  %v3845_v33 = vadd.s32 8, %v3812_v11  ;;  %v3854_v39 = vadd.s32 56, %v3812_v11 }
 0x224   :  { %2865 = vmatprep.subr.bf16.mxu1 %v3760_v0  ;;  %v3865_v16 = vadd.s32 48, %v3812_v11  ;;  %v3870_v52 = vadd.s32 40, %v3812_v11  ;;  %v3881_v26 = vadd.s32 32, %v3812_v11  ;;  %v3892_v44 = vadd.s32 88, %v3812_v11 }
 0x225   :  { %v3903_v51 = vadd.s32 80, %v3812_v11  ;;  %v3914_v1 = vadd.s32 72, %v3812_v11  ;;  %v1755_v47 = vadd.s32 64, %v3812_v11  ;;  %v3939_v6 = vadd.s32 104, %v3812_v11 }
 0x226   :  { %v1759_v18 = vadd.s32 96, %v3812_v11 }
 0x227   :  { %2866 = vmatpush3.bf16.msra.mxu1 %v3760_v0  ;;  %v3814_v0 = vand.u32 127, %v1746_v42 }
 0x228   :  { %2867 = vmatprep.subr.bf16.mxu1 %v3771_v27 }
 0x229   :  { %vm1779_vm0 = vcmp.le.s32.totalorder %v3814_v0, %v3817_v62  ;;  %vm1768_vm3 = vcmp.le.s32.totalorder %v3814_v0, %v3830_v17  ;;  %vm1765_vm4 = vcmp.le.s32.totalorder %v3814_v0, %v3812_v11  ;;  %vm1766_vm5 = vcmp.le.s32.totalorder %v3814_v0, %v3845_v33 }
 0x22a   :  { %2820 = vmatmul.mubr.bf16.gmra.mrb[120].mxu1 %v1533_v22  ;;  %vm1772_vm6 = vcmp.le.s32.totalorder %v3814_v0, %v3854_v39  ;;  %vm1771_vm7 = vcmp.le.s32.totalorder %v3814_v0, %v3865_v16  ;;  %vm1770_vm8 = vcmp.le.s32.totalorder %v3814_v0, %v3870_v52  ;;  %vm1769_vm9 = vcmp.le.s32.totalorder %v3814_v0, %v3881_v26 }
 0x22b   :  { %2823 = vmatprep.mubr.bf16.mxu1 %v1534_v58  ;;  %2868 = vmatpush3.bf16.msra.mxu1 %v3771_v27  ;;  %v3827_v27 = vadd.s32 16, %v3812_v11  ;;  %vm1776_vm10 = vcmp.le.s32.totalorder %v3814_v0, %v3892_v44  ;;  %vm1775_vm11 = vcmp.le.s32.totalorder %v3814_v0, %v3903_v51  ;;  %vm1774_vm12 = vcmp.le.s32.totalorder %v3814_v0, %v3914_v1 }
 0x22c   :  { %2869 = vmatprep.subr.bf16.mxu1 %v3769_v40  ;;  %vm1773_vm13 = vcmp.le.s32.totalorder %v3814_v0, %v1755_v47  ;;  %vm1778_vm14 = vcmp.le.s32.totalorder %v3814_v0, %v3939_v6  ;;  %vm1777_vm15 = vcmp.le.s32.totalorder %v3814_v0, %v1759_v18 }
 0x22d   :  { %vm1767_vm2 = vcmp.le.s32.totalorder %v3814_v0, %v3827_v27 }
 0x22f   :  { %2870 = vmatpush3.bf16.msra.mxu1 %v3769_v40  ;;  %v3822_v40 = vadd.s32 120, %v3812_v11 }
 0x230   :  { %2871 = vmatprep.subr.bf16.mxu1 %v3779_v46 }
 0x231   :  { %vm1780_vm1 = vcmp.le.s32.totalorder %v3814_v0, %v3822_v40 }
 0x232   :  { %2824 = vmatmul.mubr.bf16.gmra.mrb[124].mxu1 %v1535_v24 }
 0x233   :  { %2872 = vmatpush3.bf16.msra.mxu1 %v3779_v46 }
 0x234   :  { %2873 = vmatprep.subr.bf16.mxu1 %v3777_v45 }
 0x237   :  { %2874 = vmatpush3.bf16.msra.mxu1 %v3777_v45 }
 0x2ad   :  { %v2781_v8 = vpop.f32.mrb[96].mxu1 }
 0x2ae   :  { %v1586_v34 = vpop.f32.mrb[97].mxu1  ;;  %v3839_v29 = vsel %vm1767_vm2, %v2781_v8, -inf }
 0x2af   :  { %1849 = vmax.xlane.f32.xlu0 %v3839_v29  ;;  %v2782_v21 = vpop.f32.mrb[98].mxu1  ;;  %v3859_v7 = vsel %vm1765_vm4, %v1586_v34, -inf }
 0x2b0   :  { %v1589_v38 = vpop.f32.mrb[99].mxu1  ;;  %v3850_v12 = vsel %vm1768_vm3, %v2782_v21, -inf }
 0x2b1   :  { %1851 = vmax.xlane.f32.xlu1 %v3850_v12  ;;  %v3875_v48 = vsel %vm1766_vm5, %v1589_v38, -inf }
 0x2b3   :  { %1845 = vmax.xlane.f32.xlu0 %v3859_v7 }
 0x2b5   :  { %v2785_v43 = vpop.f32.mrb[100].mxu1 }
 0x2b6   :  { %v1602_v45 = vpop.f32.mrb[101].mxu1  ;;  %v3897_v50 = vsel %vm1771_vm7, %v2785_v43, -inf }
 0x2b7   :  { %1847 = vmax.xlane.f32.xlu0 %v3875_v48  ;;  %v2786_v46 = vpop.f32.mrb[102].mxu1  ;;  %v3919_v35 = vsel %vm1769_vm9, %v1602_v45, -inf }
 0x2b8   :  { %v1605_v36 = vpop.f32.mrb[103].mxu1  ;;  %v3886_v30 = vsel %vm1772_vm6, %v2786_v46, -inf }
 0x2b9   :  { %1859 = vmax.xlane.f32.xlu1 %v3886_v30  ;;  %v3908_v60 = vsel %vm1770_vm8, %v1605_v36, -inf }
 0x2bb   :  { %1857 = vmax.xlane.f32.xlu0 %v3897_v50 }
 0x2bd   :  { %1855 = vmax.xlane.f32.xlu1 %v3908_v60  ;;  %v2789_v9 = vpop.f32.mrb[104].mxu1 }
 0x2be   :  { %v1618_v23 = vpop.f32.mrb[105].mxu1  ;;  %v3936_v53 = vsel %vm1775_vm11, %v2789_v9, -inf }
 0x2bf   :  { %1853 = vmax.xlane.f32.xlu0 %v3919_v35  ;;  %v2790_v13 = vpop.f32.mrb[106].mxu1  ;;  %v3952_v61 = vsel %vm1773_vm13, %v1618_v23, -inf }
 0x2c0   :  { %v1621_v56 = vpop.f32.mrb[107].mxu1  ;;  %v3928_v25 = vsel %vm1776_vm10, %v2790_v13, -inf }
 0x2c1   :  { %1867 = vmax.xlane.f32.xlu1 %v3928_v25  ;;  %v3947_v37 = vsel %vm1774_vm12, %v1621_v56, -inf }
 0x2c3   :  { %1865 = vmax.xlane.f32.xlu0 %v3936_v53 }
 0x2c5   :  { %1863 = vmax.xlane.f32.xlu1 %v3947_v37  ;;  %v2793_v54 = vpop.f32.mrb[108].mxu1 }
 0x2c6   :  { %v1634_v57 = vpop.f32.mrb[109].mxu1  ;;  %v3959_v19 = vsel %vm1779_vm0, %v2793_v54, -inf }
 0x2c7   :  { %1861 = vmax.xlane.f32.xlu0 %v3952_v61  ;;  %v2794_v32 = vpop.f32.mrb[110].mxu1  ;;  %v3976_v2 = vsel %vm1777_vm15, %v1634_v57, -inf }
 0x2c8   :  { %v1637_v41 = vpop.f32.mrb[111].mxu1  ;;  %v3966_v49 = vsel %vm1780_vm1, %v2794_v32, -inf }
 0x2c9   :  { %v3971_v28 = vsel %vm1778_vm14, %v1637_v41, -inf }
 0x2ca   :  { %1871 = vmax.xlane.f32.xlu1 %v3971_v28 }
 0x2cb   :  { %1869 = vmax.xlane.f32.xlu0 %v3976_v2 }
 0x2ed   :  { %v2813_v55 = vpop.f32.mrb[112].mxu1 }
 0x2ee   :  { %v1683_v22 = vpop.f32.mrb[113].mxu1  ;;  %v3982_v5 = vsel %vm1767_vm2, %v2813_v55, -inf }
 0x2ef   :  { %1881 = vmax.xlane.f32.xlu0 %v3982_v5  ;;  %v2814_v10 = vpop.f32.mrb[114].mxu1  ;;  %v3988_v3 = vsel %vm1765_vm4, %v1683_v22, -inf }
 0x2f0   :  { %1877 = vmax.xlane.f32.xlu1 %v3988_v3  ;;  %v1686_v14 = vpop.f32.mrb[115].mxu1  ;;  %v3994_v59 = vsel %vm1768_vm3, %v2814_v10, -inf }
 0x2f1   :  { %v3999_v58 = vsel %vm1766_vm5, %v1686_v14, -inf }
 0x2f4   :  { %1883 = vmax.xlane.f32.xlu1 %v3994_v59 }
 0x2f5   :  { %v2817_v15 = vpop.f32.mrb[116].mxu1 }
 0x2f6   :  { %v1699_v4 = vpop.f32.mrb[117].mxu1  ;;  %v4005_v63 = vsel %vm1771_vm7, %v2817_v15, -inf }
 0x2f7   :  { %1889 = vmax.xlane.f32.xlu0 %v4005_v63  ;;  %v2818_v20 = vpop.f32.mrb[118].mxu1  ;;  %v4022_v11 = vsel %vm1769_vm9, %v1699_v4, -inf }
 0x2f8   :  { %1879 = vmax.xlane.f32.xlu1 %v3999_v58  ;;  %v1702_v31 = vpop.f32.mrb[119].mxu1  ;;  %v4012_v24 = vsel %vm1772_vm6, %v2818_v20, -inf }
 0x2f9   :  { %v4017_v42 = vsel %vm1770_vm8, %v1702_v31, -inf }
 0x2fb   :  { %1885 = vmax.xlane.f32.xlu0 %v4022_v11 }
 0x2fc   :  { %1891 = vmax.xlane.f32.xlu1 %v4012_v24 }
 0x2fd   :  { %v2821_v27 = vpop.f32.mrb[120].mxu1 }
 0x2fe   :  { %v1715_v17 = vpop.f32.mrb[121].mxu1  ;;  %v4029_v8 = vsel %vm1775_vm11, %v2821_v27, -inf }
 0x2ff   :  { %1897 = vmax.xlane.f32.xlu0 %v4029_v8  ;;  %v2822_v34 = vpop.f32.mrb[122].mxu1  ;;  %v4045_v39 = vsel %vm1773_vm13, %v1715_v17, -inf }
 0x300   :  { %1887 = vmax.xlane.f32.xlu1 %v4017_v42  ;;  %v1718_v21 = vpop.f32.mrb[123].mxu1  ;;  %v4036_v33 = vsel %vm1776_vm10, %v2822_v34, -inf }
 0x301   :  { %v4041_v38 = vsel %vm1774_vm12, %v1718_v21, -inf }
 0x303   :  { %1893 = vmax.xlane.f32.xlu0 %v4045_v39 }
 0x304   :  { %1899 = vmax.xlane.f32.xlu1 %v4036_v33 }
 0x305   :  { %v2825_v16 = vpop.f32.mrb[124].mxu1 }
 0x306   :  { %v1731_v43 = vpop.f32.mrb[125].mxu1  ;;  %v4052_v52 = vsel %vm1779_vm0, %v2825_v16, -inf }
 0x307   :  { %1873 = vmax.xlane.f32.xlu0 %v3959_v19  ;;  %v2826_v45 = vpop.f32.mrb[126].mxu1  ;;  %v4057_v46 = vsel %vm1777_vm15, %v1731_v43, -inf }
 0x308   :  { %1895 = vmax.xlane.f32.xlu1 %v4041_v38  ;;  %v1734_v26 = vpop.f32.mrb[127].mxu1  ;;  %v4063_v36 = vsel %vm1780_vm1, %v2826_v45, -inf }
 0x309   :  { %v4068_v62 = vsel %vm1778_vm14, %v1734_v26, -inf }
 0x30b   :  { %1901 = vmax.xlane.f32.xlu0 %v4057_v46 }
 0x30c   :  { %1875 = vmax.xlane.f32.xlu1 %v3966_v49 }
 0x30f   :  { %1905 = vmax.xlane.f32.xlu0 %v4052_v52 }
 0x310   :  { %1903 = vmax.xlane.f32.xlu1 %v4068_v62 }
 0x314   :  { %1907 = vmax.xlane.f32.xlu1 %v4063_v36 }
 0x33c   :  { %v1850_v44 = vpop.xlane.xlu0 %1849 }
 0x33d   :  { %v1911_v40 = vsub.f32 %v3839_v29, %v1850_v44 }
 0x33e   :  { %v1852_v51 = vpop.xlane.xlu1 %1851 }
 0x33f   :  { %v1945_v9 = vmul.f32 1.442695, %v1911_v40  ;;  %v1912_v1 = vsub.f32 %v3850_v12, %v1852_v51 }
 0x340   :  { %v1846_v0 = vpop.xlane.xlu0 %1845 }
 0x341   :  { %3116 = vpow2.f32 %v1945_v9  ;;  %v1947_v23 = vmul.f32 1.442695, %v1912_v1  ;;  %v1909_v13 = vsub.f32 %v3859_v7, %v1846_v0 }
 0x343   :  { %3118 = vpow2.f32 %v1947_v23  ;;  %v1941_v47 = vmul.f32 1.442695, %v1909_v13 }
 0x344   :  { %v1848_v56 = vpop.xlane.xlu0 %1847 }
 0x345   :  { %3120 = vpow2.f32 %v1941_v47  ;;  %v1910_v6 = vsub.f32 %v3875_v48, %v1848_v56 }
 0x346   :  { %v1860_v18 = vpop.xlane.xlu1 %1859 }
 0x347   :  { %v1943_v54 = vmul.f32 1.442695, %v1910_v6  ;;  %v1916_v57 = vsub.f32 %v3886_v30, %v1860_v18 }
 0x348   :  { %v1858_v29 = vpop.xlane.xlu0 %1857 }
 0x349   :  { %3122 = vpow2.f32 %v1943_v54  ;;  %v1955_v32 = vmul.f32 1.442695, %v1916_v57  ;;  %v1915_v12 = vsub.f32 %v3897_v50, %v1858_v29 }
 0x34a   :  { %v1856_v41 = vpop.xlane.xlu1 %1855 }
 0x34b   :  { %v4081_v55 = vpop.eup %3116  ;;  %v1953_v22 = vmul.f32 1.442695, %v1915_v12  ;;  %v1914_v7 = vsub.f32 %v3908_v60, %v1856_v41  ;;  %3124 = vpow2.f32 %v1955_v32 }
 0x34c   :  { %v1854_v10 = vpop.xlane.xlu0 %1853  ;;  %2009 = vadd.xlane.f32.xlu0 %v4081_v55 }
 0x34d   :  { %v4085_v48 = vpop.eup %3118  ;;  %3126 = vpow2.f32 %v1953_v22  ;;  %v1951_v14 = vmul.f32 1.442695, %v1914_v7  ;;  %v1913_v30 = vsub.f32 %v3919_v35, %v1854_v10 }
 0x34e   :  { %v1868_v15 = vpop.xlane.xlu1 %1867  ;;  %2011 = vadd.xlane.f32.xlu1 %v4085_v48 }
 0x34f   :  { %v4089_v50 = vpop.eup %3120  ;;  %v1949_v4 = vmul.f32 1.442695, %v1913_v30  ;;  %v1920_v20 = vsub.f32 %v3928_v25, %v1868_v15  ;;  %3128 = vpow2.f32 %v1951_v14 }
 0x350   :  { %v1866_v60 = vpop.xlane.xlu0 %1865  ;;  %2005 = vadd.xlane.f32.xlu0 %v4089_v50 }
 0x351   :  { %3130 = vpow2.f32 %v1949_v4  ;;  %v1963_v31 = vmul.f32 1.442695, %v1920_v20  ;;  %v1919_v27 = vsub.f32 %v3936_v53, %v1866_v60 }
 0x352   :  { %v1864_v17 = vpop.xlane.xlu1 %1863 }
 0x353   :  { %v4094_v34 = vpop.eup %3122  ;;  %v1961_v35 = vmul.f32 1.442695, %v1919_v27  ;;  %v1918_v21 = vsub.f32 %v3947_v37, %v1864_v17  ;;  %3132 = vpow2.f32 %v1963_v31 }
 0x354   :  { %v1862_v16 = vpop.xlane.xlu0 %1861  ;;  %2007 = vadd.xlane.f32.xlu1 %v4094_v34 }
 0x355   :  { %3134 = vpow2.f32 %v1961_v35  ;;  %v1959_v25 = vmul.f32 1.442695, %v1918_v21  ;;  %v1917_v43 = vsub.f32 %v3952_v61, %v1862_v16  ;;  %v4099_v45 = vpop.eup %3124 }
 0x357   :  { %v4101_v26 = vpop.eup %3126  ;;  %v1957_v44 = vmul.f32 1.442695, %v1917_v43  ;;  %v1872_v53 = vpop.xlane.xlu1 %1871  ;;  %3136 = vpow2.f32 %v1959_v25 }
 0x358   :  { %v1922_v40 = vsub.f32 %v3971_v28, %v1872_v53  ;;  %v1870_v51 = vpop.xlane.xlu0 %1869  ;;  %2017 = vadd.xlane.f32.xlu0 %v4101_v26  ;;  %2019 = vadd.xlane.f32.xlu1 %v4099_v45 }
 0x359   :  { %3138 = vpow2.f32 %v1957_v44  ;;  %v1921_v37 = vsub.f32 %v3976_v2, %v1870_v51  ;;  %v4107_v9 = vpop.eup %3128 }
 0x35a   :  { %v1967_v61 = vmul.f32 1.442695, %v1922_v40 }
 0x35b   :  { %v4109_v1 = vpop.eup %3130  ;;  %v1965_v0 = vmul.f32 1.442695, %v1921_v37 }
 0x35c   :  { %3140 = vpow2.f32 %v1967_v61  ;;  %2013 = vadd.xlane.f32.xlu0 %v4109_v1  ;;  %2015 = vadd.xlane.f32.xlu1 %v4107_v9 }
 0x35d   :  { %3142 = vpow2.f32 %v1965_v0  ;;  %v4113_v28 = vpop.eup %3132 }
 0x35f   :  { %v4115_v23 = vpop.eup %3134 }
 0x360   :  { %2025 = vadd.xlane.f32.xlu0 %v4115_v23  ;;  %2027 = vadd.xlane.f32.xlu1 %v4113_v28 }
 0x361   :  { %v4119_v2 = vpop.eup %3136 }
 0x363   :  { %v4121_v13 = vpop.eup %3138 }
 0x364   :  { %2021 = vadd.xlane.f32.xlu0 %v4121_v13  ;;  %2023 = vadd.xlane.f32.xlu1 %v4119_v2 }
 0x366   :  { %v4125_v47 = vpop.eup %3140 }
 0x367   :  { %v4127_v56 = vpop.eup %3142 }
 0x368   :  { %2029 = vadd.xlane.f32.xlu0 %v4127_v56  ;;  %2031 = vadd.xlane.f32.xlu1 %v4125_v47 }
 0x37c   :  { %v1882_v6 = vpop.xlane.xlu0 %1881 }
 0x37d   :  { %v1927_v18 = vsub.f32 %v3982_v5, %v1882_v6  ;;  %v1878_v54 = vpop.xlane.xlu1 %1877 }
 0x37e   :  { %v1925_v57 = vsub.f32 %v3988_v3, %v1878_v54 }
 0x37f   :  { %v1977_v29 = vmul.f32 1.442695, %v1927_v18 }
 0x380   :  { %v1973_v32 = vmul.f32 1.442695, %v1925_v57 }
 0x381   :  { %3144 = vpow2.f32 %v1977_v29  ;;  %v1884_v12 = vpop.xlane.xlu1 %1883 }
 0x382   :  { %v1928_v41 = vsub.f32 %v3994_v59, %v1884_v12  ;;  %3146 = vpow2.f32 %v1973_v32 }
 0x384   :  { %v1979_v22 = vmul.f32 1.442695, %v1928_v41  ;;  %v1890_v7 = vpop.xlane.xlu0 %1889 }
 0x385   :  { %v1931_v10 = vsub.f32 %v4005_v63, %v1890_v7  ;;  %v1880_v14 = vpop.xlane.xlu1 %1879 }
 0x386   :  { %3148 = vpow2.f32 %v1979_v22  ;;  %v1926_v30 = vsub.f32 %v3999_v58, %v1880_v14 }
 0x387   :  { %v1985_v15 = vmul.f32 1.442695, %v1931_v10 }
 0x388   :  { %v1975_v5 = vmul.f32 1.442695, %v1926_v30  ;;  %v1886_v4 = vpop.xlane.xlu0 %1885 }
 0x389   :  { %3150 = vpow2.f32 %v1985_v15  ;;  %v1929_v3 = vsub.f32 %v4022_v11, %v1886_v4  ;;  %v1892_v20 = vpop.xlane.xlu1 %1891 }
 0x38a   :  { %3152 = vpow2.f32 %v1975_v5  ;;  %v1932_v60 = vsub.f32 %v4012_v24, %v1892_v20 }
 0x38b   :  { %v4138_v59 = vpop.eup %3144  ;;  %v1981_v31 = vmul.f32 1.442695, %v1929_v3 }
 0x38c   :  { %v1987_v27 = vmul.f32 1.442695, %v1932_v60  ;;  %v1898_v17 = vpop.xlane.xlu0 %1897  ;;  %2041 = vadd.xlane.f32.xlu0 %v4138_v59  ;;  %v4143_v21 = vpop.eup %3146 }
 0x38d   :  { %3154 = vpow2.f32 %v1981_v31  ;;  %v1935_v58 = vsub.f32 %v4029_v8, %v1898_v17  ;;  %v1888_v63 = vpop.xlane.xlu1 %1887 }
 0x38e   :  { %3156 = vpow2.f32 %v1987_v27  ;;  %v1930_v35 = vsub.f32 %v4017_v42, %v1888_v63 }
 0x38f   :  { %v1993_v11 = vmul.f32 1.442695, %v1935_v58 }
 0x390   :  { %v4145_v16 = vpop.eup %3148  ;;  %v1983_v24 = vmul.f32 1.442695, %v1930_v35  ;;  %v1894_v25 = vpop.xlane.xlu0 %1893  ;;  %2037 = vadd.xlane.f32.xlu0 %v4143_v21 }
 0x391   :  { %3158 = vpow2.f32 %v1993_v11  ;;  %v1933_v43 = vsub.f32 %v4045_v39, %v1894_v25  ;;  %v1900_v44 = vpop.xlane.xlu1 %1899  ;;  %2043 = vadd.xlane.f32.xlu1 %v4145_v16 }
 0x392   :  { %3160 = vpow2.f32 %v1983_v24  ;;  %v1936_v8 = vsub.f32 %v4036_v33, %v1900_v44 }
 0x393   :  { %v4151_v53 = vpop.eup %3150  ;;  %v1989_v42 = vmul.f32 1.442695, %v1933_v43 }
 0x394   :  { %v4153_v40 = vpop.eup %3152  ;;  %v1995_v51 = vmul.f32 1.442695, %v1936_v8  ;;  %v1874_v37 = vpop.xlane.xlu0 %1873  ;;  %2049 = vadd.xlane.f32.xlu0 %v4151_v53 }
 0x395   :  { %3162 = vpow2.f32 %v1989_v42  ;;  %v1923_v61 = vsub.f32 %v3959_v19, %v1874_v37  ;;  %v1896_v0 = vpop.xlane.xlu1 %1895  ;;  %2039 = vadd.xlane.f32.xlu1 %v4153_v40 }
 0x396   :  { %3164 = vpow2.f32 %v1995_v51  ;;  %v1934_v39 = vsub.f32 %v4041_v38, %v1896_v0 }
 0x397   :  { %v4159_v6 = vpop.eup %3154  ;;  %v1969_v33 = vmul.f32 1.442695, %v1923_v61 }
 0x398   :  { %v4161_v18 = vpop.eup %3156  ;;  %v1991_v54 = vmul.f32 1.442695, %v1934_v39  ;;  %2045 = vadd.xlane.f32.xlu0 %v4159_v6  ;;  %v1902_v57 = vpop.xlane.xlu0 %1901 }
 0x399   :  { %3166 = vpow2.f32 %v1969_v33  ;;  %v1937_v29 = vsub.f32 %v4057_v46, %v1902_v57  ;;  %v1876_v32 = vpop.xlane.xlu1 %1875  ;;  %2051 = vadd.xlane.f32.xlu1 %v4161_v18 }
 0x39a   :  { %3168 = vpow2.f32 %v1991_v54  ;;  %v1924_v19 = vsub.f32 %v3966_v49, %v1876_v32 }
 0x39b   :  { %v4167_v12 = vpop.eup %3158  ;;  %v1997_v38 = vmul.f32 1.442695, %v1937_v29 }
 0x39c   :  { %v4169_v41 = vpop.eup %3160  ;;  %v1971_v22 = vmul.f32 1.442695, %v1924_v19  ;;  %2057 = vadd.xlane.f32.xlu0 %v4167_v12  ;;  %v1906_v7 = vpop.xlane.xlu0 %1905 }
 0x39d   :  { %3170 = vpow2.f32 %v1997_v38  ;;  %v1939_v10 = vsub.f32 %v4052_v52, %v1906_v7  ;;  %2047 = vadd.xlane.f32.xlu1 %v4169_v41  ;;  %v1904_v46 = vpop.xlane.xlu1 %1903 }
 0x39e   :  { %3172 = vpow2.f32 %v1971_v22  ;;  %v1938_v14 = vsub.f32 %v4068_v62, %v1904_v46 }
 0x39f   :  { %v4175_v30 = vpop.eup %3162  ;;  %v2001_v49 = vmul.f32 1.442695, %v1939_v10 }
 0x3a0   :  { %v4177_v15 = vpop.eup %3164  ;;  %v1999_v5 = vmul.f32 1.442695, %v1938_v14  ;;  %2053 = vadd.xlane.f32.xlu0 %v4175_v30 }
 0x3a1   :  { %3174 = vpow2.f32 %v2001_v49  ;;  %2059 = vadd.xlane.f32.xlu1 %v4177_v15  ;;  %v1908_v4 = vpop.xlane.xlu1 %1907 }
 0x3a2   :  { %3176 = vpow2.f32 %v1999_v5  ;;  %v1940_v52 = vsub.f32 %v4063_v36, %v1908_v4 }
 0x3a3   :  { %v4182_v3 = vpop.eup %3166 }
 0x3a4   :  { %v4184_v20 = vpop.eup %3168  ;;  %v2003_v62 = vmul.f32 1.442695, %v1940_v52  ;;  %2033 = vadd.xlane.f32.xlu0 %v4182_v3 }
 0x3a5   :  { %2055 = vadd.xlane.f32.xlu1 %v4184_v20 }
 0x3a6   :  { %3178 = vpow2.f32 %v2003_v62 }
 0x3a7   :  { %v4188_v60 = vpop.eup %3170 }
 0x3a8   :  { %v4190_v31 = vpop.eup %3172  ;;  %2061 = vadd.xlane.f32.xlu0 %v4188_v60 }
 0x3a9   :  { %2035 = vadd.xlane.f32.xlu1 %v4190_v31 }
 0x3ab   :  { %v4194_v27 = vpop.eup %3174 }
 0x3ac   :  { %v4196_v36 = vpop.eup %3176  ;;  %2065 = vadd.xlane.f32.xlu0 %v4194_v27 }
 0x3ad   :  { %2063 = vadd.xlane.f32.xlu1 %v4196_v36 }
 0x3b0   :  { %v4200_v17 = vpop.eup %3178 }
 0x3b1   :  { %2067 = vadd.xlane.f32.xlu1 %v4200_v17 }
 0x3d9   :  { %v2010_v58 = vpop.xlane.xlu0 %2009 }
 0x3db   :  { %v2012_v63 = vpop.xlane.xlu1 %2011 }
 0x3dc   :  { %3180 = vrcp.f32 %v2012_v63 }
 0x3dd   :  { %v2006_v35 = vpop.xlane.xlu0 %2005 }
 0x3de   :  { %3182 = vrcp.f32 %v2006_v35 }
 0x3df   :  { %3184 = vrcp.f32 %v2010_v58 }
 0x3e1   :  { %v2008_v11 = vpop.xlane.xlu1 %2007 }
 0x3e2   :  { %3186 = vrcp.f32 %v2008_v11 }
 0x3e5   :  { %v2018_v24 = vpop.xlane.xlu0 %2017  ;;  %v2020_v25 = vpop.xlane.xlu1 %2019 }
 0x3e6   :  { %3188 = vrcp.f32 %v2018_v24  ;;  %v3181_v43 = vpop.eup %3180 }
 0x3e7   :  { %3190 = vrcp.f32 %v2020_v25  ;;  %v2104_v61 = vmul.f32 %v3181_v43, %v4085_v48 }
 0x3e8   :  { %v3183_v42 = vpop.eup %3182 }
 0x3e9   :  { %v2014_v44 = vpop.xlane.xlu0 %2013  ;;  %v2016_v8 = vpop.xlane.xlu1 %2015  ;;  %v2101_v33 = vmul.f32 %v3183_v42, %v4089_v50 }
 0x3ea   :  { %3192 = vrcp.f32 %v2014_v44  ;;  %v3185_v51 = vpop.eup %3184 }
 0x3eb   :  { %3194 = vrcp.f32 %v2016_v8  ;;  %v2103_v57 = vmul.f32 %v3185_v51, %v4081_v55 }
 0x3ec   :  { %v3187_v37 = vpop.eup %3186 }
 0x3ed   :  { %v2026_v0 = vpop.xlane.xlu0 %2025  ;;  %v2028_v39 = vpop.xlane.xlu1 %2027  ;;  %v2102_v54 = vmul.f32 %v3187_v37, %v4094_v34  ;;  %v2134_v32 = vpack.c.bf16 %v2104_v61, %v2103_v57 }
 0x3ee   :  { %3196 = vrcp.f32 %v2026_v0 }
 0x3ef   :  { %v2133_v29 = vpack.c.bf16 %v2102_v54, %v2101_v33  ;;  %3198 = vrcp.f32 %v2028_v39 }
 0x3f0   :  { %v3189_v19 = vpop.eup %3188 }
 0x3f1   :  { %v2022_v38 = vpop.xlane.xlu0 %2021  ;;  %2843 = vmatprep.mubr.bf16.mxu0 %v2133_v29  ;;  %v2024_v22 = vpop.xlane.xlu1 %2023  ;;  %v2107_v55 = vmul.f32 %v3189_v19, %v4101_v26 }
 0x3f2   :  { %v3191_v7 = vpop.eup %3190  ;;  %3200 = vrcp.f32 %v2022_v38  ;;  %2844 = vmatmul.mubr.bf16.vlgmr.msra.gmra.mrb[64].mxu0 %v2134_v32 }
 0x3f3   :  { %3202 = vrcp.f32 %v2024_v22  ;;  %v2108_v14 = vmul.f32 %v3191_v7, %v4099_v45 }
 0x3f4   :  { %v3193_v48 = vpop.eup %3192 }
 0x3f5   :  { %v3195_v10 = vpop.eup %3194  ;;  %v2030_v46 = vpop.xlane.xlu0 %2029  ;;  %v2105_v34 = vmul.f32 %v3193_v48, %v4109_v1  ;;  %v2136_v52 = vpack.c.bf16 %v2108_v14, %v2107_v55 }
 0x3f6   :  { %v2032_v50 = vpop.xlane.xlu1 %2031  ;;  %3204 = vrcp.f32 %v2030_v46  ;;  %v2106_v49 = vmul.f32 %v3195_v10, %v4107_v9 }
 0x3f7   :  { %3206 = vrcp.f32 %v2032_v50 }
 0x3f8   :  { %v2135_v5 = vpack.c.bf16 %v2106_v49, %v2105_v34  ;;  %v3197_v4 = vpop.eup %3196 }
 0x3f9   :  { %v3199_v62 = vpop.eup %3198  ;;  %v2111_v1 = vmul.f32 %v3197_v4, %v4115_v23 }
 0x3fa   :  { %2847 = vmatprep.mubr.bf16.mxu0 %v2135_v5  ;;  %v2112_v26 = vmul.f32 %v3199_v62, %v4113_v28 }
 0x3fb   :  { %2848 = vmatmul.mubr.bf16.gmra.mrb[68].mxu0 %v2136_v52 }
 0x3fc   :  { %v3201_v58 = vpop.eup %3200  ;;  %v2138_v25 = vpack.c.bf16 %v2112_v26, %v2111_v1 }
 0x3fd   :  { %v3203_v63 = vpop.eup %3202  ;;  %v2109_v35 = vmul.f32 %v3201_v58, %v4121_v13 }
 0x3fe   :  { %v2110_v45 = vmul.f32 %v3203_v63, %v4119_v2 }
 0x400   :  { %v3205_v11 = vpop.eup %3204  ;;  %v2137_v24 = vpack.c.bf16 %v2110_v45, %v2109_v35 }
 0x401   :  { %v3207_v9 = vpop.eup %3206  ;;  %v2113_v43 = vmul.f32 %v3205_v11, %v4127_v56 }
 0x402   :  { %2851 = vmatprep.mubr.bf16.mxu0 %v2137_v24  ;;  %v2114_v44 = vmul.f32 %v3207_v9, %v4125_v47 }
 0x403   :  { %2852 = vmatmul.mubr.bf16.gmra.mrb[72].mxu0 %v2138_v25 }
 0x404   :  { %v2139_v8 = vpack.c.bf16 %v2114_v44, %v2113_v43 }
 0x406   :  { %2855 = vmatprep.mubr.bf16.mxu0 %v2139_v8 }
 0x419   :  { %v2042_v42 = vpop.xlane.xlu0 %2041 }
 0x41d   :  { %v2038_v13 = vpop.xlane.xlu0 %2037 }
 0x41e   :  { %v2044_v51 = vpop.xlane.xlu1 %2043 }
 0x41f   :  { %3208 = vrcp.f32 %v2044_v51 }
 0x420   :  { %3210 = vrcp.f32 %v2038_v13 }
 0x421   :  { %v2050_v28 = vpop.xlane.xlu0 %2049  ;;  %3212 = vrcp.f32 %v2042_v42 }
 0x422   :  { %v2040_v23 = vpop.xlane.xlu1 %2039 }
 0x423   :  { %3214 = vrcp.f32 %v2040_v23 }
 0x425   :  { %v2046_v2 = vpop.xlane.xlu0 %2045 }
 0x426   :  { %v2052_v37 = vpop.xlane.xlu1 %2051 }
 0x427   :  { %3216 = vrcp.f32 %v2052_v37 }
 0x428   :  { %3218 = vrcp.f32 %v2046_v2 }
 0x429   :  { %v2058_v56 = vpop.xlane.xlu0 %2057  ;;  %v3209_v61 = vpop.eup %3208  ;;  %3220 = vrcp.f32 %v2050_v28 }
 0x42a   :  { %v2048_v47 = vpop.xlane.xlu1 %2047  ;;  %v3211_v0 = vpop.eup %3210  ;;  %v2120_v54 = vmul.f32 %v3209_v61, %v4145_v16 }
 0x42b   :  { %3222 = vrcp.f32 %v2048_v47  ;;  %v3213_v39 = vpop.eup %3212  ;;  %v2117_v32 = vmul.f32 %v3211_v0, %v4143_v21 }
 0x42c   :  { %v2119_v38 = vmul.f32 %v3213_v39, %v4138_v59 }
 0x42d   :  { %v3215_v33 = vpop.eup %3214  ;;  %v2054_v57 = vpop.xlane.xlu0 %2053 }
 0x42e   :  { %v2060_v29 = vpop.xlane.xlu1 %2059  ;;  %v2118_v19 = vmul.f32 %v3215_v33, %v4153_v40  ;;  %v2142_v48 = vpack.c.bf16 %v2120_v54, %v2119_v38 }
 0x42f   :  { %3224 = vrcp.f32 %v2060_v29 }
 0x430   :  { %v2141_v22 = vpack.c.bf16 %v2118_v19, %v2117_v32  ;;  %3226 = vrcp.f32 %v2054_v57 }
 0x431   :  { %v2034_v7 = vpop.xlane.xlu0 %2033  ;;  %v3217_v10 = vpop.eup %3216  ;;  %3228 = vrcp.f32 %v2058_v56 }
 0x432   :  { %2875 = vmatprep.mubr.bf16.mxu1 %v2141_v22  ;;  %v2056_v46 = vpop.xlane.xlu1 %2055  ;;  %v3219_v50 = vpop.eup %3218  ;;  %v2124_v40 = vmul.f32 %v3217_v10, %v4161_v18 }
 0x433   :  { %3230 = vrcp.f32 %v2056_v46  ;;  %2876 = vmatmul.mubr.bf16.vlgmr.msra.gmra.mrb[128].mxu1 %v2142_v48  ;;  %v3221_v16 = vpop.eup %3220  ;;  %v2121_v59 = vmul.f32 %v3219_v50, %v4159_v6 }
 0x434   :  { %3232 = vrcp.f32 %v2034_v7  ;;  %v2123_v49 = vmul.f32 %v3221_v16, %v4151_v53 }
 0x435   :  { %v3223_v34 = vpop.eup %3222  ;;  %v2062_v21 = vpop.xlane.xlu0 %2061 }
 0x436   :  { %v2036_v55 = vpop.xlane.xlu1 %2035  ;;  %v2122_v14 = vmul.f32 %v3223_v34, %v4169_v41  ;;  %v2144_v4 = vpack.c.bf16 %v2124_v40, %v2123_v49 }
 0x437   :  { %3234 = vrcp.f32 %v2036_v55 }
 0x438   :  { %v2143_v5 = vpack.c.bf16 %v2122_v14, %v2121_v59  ;;  %3236 = vrcp.f32 %v2062_v21 }
 0x439   :  { %v3225_v52 = vpop.eup %3224  ;;  %v2066_v62 = vpop.xlane.xlu0 %2065 }
 0x43a   :  { %2879 = vmatprep.mubr.bf16.mxu1 %v2143_v5  ;;  %v2064_v58 = vpop.xlane.xlu1 %2063  ;;  %v3227_v63 = vpop.eup %3226  ;;  %v2128_v6 = vmul.f32 %v3225_v52, %v4177_v15 }
 0x43b   :  { %3238 = vrcp.f32 %v2064_v58  ;;  %2880 = vmatmul.mubr.bf16.gmra.mrb[132].mxu1 %v2144_v4  ;;  %v3229_v35 = vpop.eup %3228  ;;  %v2125_v41 = vmul.f32 %v3227_v63, %v4175_v30 }
 0x43c   :  { %3240 = vrcp.f32 %v2066_v62  ;;  %v2127_v45 = vmul.f32 %v3229_v35, %v4167_v12 }
 0x43d   :  { %v3231_v18 = vpop.eup %3230 }
 0x43e   :  { %v2068_v1 = vpop.xlane.xlu1 %2067  ;;  %v2126_v53 = vmul.f32 %v3231_v18, %v4184_v20  ;;  %v3233_v26 = vpop.eup %3232  ;;  %v2146_v9 = vpack.c.bf16 %v2128_v6, %v2127_v45 }
 0x43f   :  { %3242 = vrcp.f32 %v2068_v1  ;;  %v2115_v25 = vmul.f32 %v3233_v26, %v4182_v3 }
 0x440   :  { %v2145_v11 = vpack.c.bf16 %v2126_v53, %v2125_v41 }
 0x441   :  { %v3235_v24 = vpop.eup %3234 }
 0x442   :  { %2883 = vmatprep.mubr.bf16.mxu1 %v2145_v11  ;;  %v2116_v43 = vmul.f32 %v3235_v24, %v4190_v31  ;;  %v3237_v44 = vpop.eup %3236 }
 0x443   :  { %2884 = vmatmul.mubr.bf16.gmra.mrb[136].mxu1 %v2146_v9  ;;  %v2129_v30 = vmul.f32 %v3237_v44, %v4188_v60 }
 0x444   :  { %v2140_v15 = vpack.c.bf16 %v2116_v43, %v2115_v25 }
 0x445   :  { %v3239_v8 = vpop.eup %3238 }
 0x446   :  { %2856 = vmatmul.mubr.bf16.gmra.mrb[76].mxu0 %v2140_v15  ;;  %v2130_v20 = vmul.f32 %v3239_v8, %v4196_v36  ;;  %v3241_v42 = vpop.eup %3240 }
 0x447   :  { %v2131_v51 = vmul.f32 %v3241_v42, %v4194_v27 }
 0x448   :  { %v2147_v13 = vpack.c.bf16 %v2130_v20, %v2129_v30 }
 0x449   :  { %v3243_v12 = vpop.eup %3242 }
 0x44a   :  { %2887 = vmatprep.mubr.bf16.mxu1 %v2147_v13  ;;  %v2132_v28 = vmul.f32 %v3243_v12, %v4200_v17 }
 0x44c   :  { %v2148_v3 = vpack.c.bf16 %v2132_v28, %v2131_v51 }
 0x44e   :  { %2888 = vmatmul.mubr.bf16.gmra.mrb[140].mxu1 %v2148_v3 }
 0x4c5   :  { %v2845_v31 = vpop.f32.mrb[64].mxu0 }
 0x4c6   :  { %2361 = vst [vmem:[%s4333_s2 + $0x10] sm:$0xff] %v2845_v31  ;;  %v2199_v23 = vpop.f32.mrb[65].mxu0 }
 0x4c7   :  { %2359 = vst [vmem:[%s4333_s2] sm:$0xff] %v2199_v23  ;;  %v2846_v60 = vpop.f32.mrb[66].mxu0 }
 0x4c8   :  { %2362 = vst [vmem:[%s4333_s2 + $0x18] sm:$0xff] %v2846_v60  ;;  %v2202_v27 = vpop.f32.mrb[67].mxu0 }
 0x4c9   :  { %2360 = vst [vmem:[%s4333_s2 + $0x8] sm:$0xff] %v2202_v27 }
 0x4ce   :  { %v2849_v36 = vpop.f32.mrb[68].mxu0 }
 0x4cf   :  { %2365 = vst [vmem:[%s4333_s2 + $0x30] sm:$0xff] %v2849_v36  ;;  %v2215_v17 = vpop.f32.mrb[69].mxu0 }
 0x4d0   :  { %2363 = vst [vmem:[%s4333_s2 + $0x20] sm:$0xff] %v2215_v17  ;;  %v2850_v2 = vpop.f32.mrb[70].mxu0 }
 0x4d1   :  { %2366 = vst [vmem:[%s4333_s2 + $0x38] sm:$0xff] %v2850_v2  ;;  %v2218_v37 = vpop.f32.mrb[71].mxu0 }
 0x4d2   :  { %2364 = vst [vmem:[%s4333_s2 + $0x28] sm:$0xff] %v2218_v37 }
 0x4d6   :  { %v2853_v56 = vpop.f32.mrb[72].mxu0 }
 0x4d7   :  { %2369 = vst [vmem:[%s4333_s2 + $0x50] sm:$0xff] %v2853_v56  ;;  %v2231_v61 = vpop.f32.mrb[73].mxu0 }
 0x4d8   :  { %2367 = vst [vmem:[%s4333_s2 + $0x40] sm:$0xff] %v2231_v61  ;;  %v2854_v47 = vpop.f32.mrb[74].mxu0 }
 0x4d9   :  { %2370 = vst [vmem:[%s4333_s2 + $0x58] sm:$0xff] %v2854_v47  ;;  %v2234_v0 = vpop.f32.mrb[75].mxu0 }
 0x4da   :  { %2368 = vst [vmem:[%s4333_s2 + $0x48] sm:$0xff] %v2234_v0 }
 0x506   :  { %v2877_v39 = vpop.f32.mrb[128].mxu1 }
 0x507   :  { %2377 = vst [vmem:[%s4333_s2 + $0x90] sm:$0xff] %v2877_v39  ;;  %v2296_v33 = vpop.f32.mrb[129].mxu1 }
 0x508   :  { %2375 = vst [vmem:[%s4333_s2 + $0x80] sm:$0xff] %v2296_v33  ;;  %v2878_v54 = vpop.f32.mrb[130].mxu1 }
 0x509   :  { %2378 = vst [vmem:[%s4333_s2 + $0x98] sm:$0xff] %v2878_v54  ;;  %v2299_v57 = vpop.f32.mrb[131].mxu1 }
 0x50a   :  { %2376 = vst [vmem:[%s4333_s2 + $0x88] sm:$0xff] %v2299_v57 }
 0x50e   :  { %v2881_v29 = vpop.f32.mrb[132].mxu1 }
 0x50f   :  { %2381 = vst [vmem:[%s4333_s2 + $0xb0] sm:$0xff] %v2881_v29  ;;  %v2312_v32 = vpop.f32.mrb[133].mxu1 }
 0x510   :  { %2379 = vst [vmem:[%s4333_s2 + $0xa0] sm:$0xff] %v2312_v32  ;;  %v2882_v19 = vpop.f32.mrb[134].mxu1 }
 0x511   :  { %2382 = vst [vmem:[%s4333_s2 + $0xb8] sm:$0xff] %v2882_v19  ;;  %v2315_v38 = vpop.f32.mrb[135].mxu1 }
 0x512   :  { %2380 = vst [vmem:[%s4333_s2 + $0xa8] sm:$0xff] %v2315_v38 }
 0x516   :  { %v2885_v22 = vpop.f32.mrb[136].mxu1 }
 0x517   :  { %2385 = vst [vmem:[%s4333_s2 + $0xd0] sm:$0xff] %v2885_v22  ;;  %v2328_v7 = vpop.f32.mrb[137].mxu1 }
 0x518   :  { %2383 = vst [vmem:[%s4333_s2 + $0xc0] sm:$0xff] %v2328_v7  ;;  %v2886_v48 = vpop.f32.mrb[138].mxu1 }
 0x519   :  { %2386 = vst [vmem:[%s4333_s2 + $0xd8] sm:$0xff] %v2886_v48  ;;  %v2857_v10 = vpop.f32.mrb[76].mxu0  ;;  %v2331_v46 = vpop.f32.mrb[139].mxu1 }
 0x51a   :  { %2373 = vst [vmem:[%s4333_s2 + $0x70] sm:$0xff] %v2857_v10  ;;  %2384 = vst [vmem:[%s4333_s2 + $0xc8] sm:$0xff] %v2331_v46  ;;  %v2247_v50 = vpop.f32.mrb[77].mxu0 }
 0x51b   :  { %2371 = vst [vmem:[%s4333_s2 + $0x60] sm:$0xff] %v2247_v50  ;;  %v2858_v16 = vpop.f32.mrb[78].mxu0 }
 0x51c   :  { %2374 = vst [vmem:[%s4333_s2 + $0x78] sm:$0xff] %v2858_v16  ;;  %v2250_v34 = vpop.f32.mrb[79].mxu0 }
 0x51d   :  { %2372 = vst [vmem:[%s4333_s2 + $0x68] sm:$0xff] %v2250_v34 }
 0x521   :  { %v2889_v21 = vpop.f32.mrb[140].mxu1 }
 0x522   :  { %2389 = vst [vmem:[%s4333_s2 + $0xf0] sm:$0xff] %v2889_v21  ;;  %v2344_v40 = vpop.f32.mrb[141].mxu1 }
 0x523   :  { %2387 = vst [vmem:[%s4333_s2 + $0xe0] sm:$0xff] %v2344_v40  ;;  %v2890_v55 = vpop.f32.mrb[142].mxu1 }
 0x524   :  { %2390 = vst [vmem:[%s4333_s2 + $0xf8] sm:$0xff] %v2890_v55  ;;  %v2347_v59 = vpop.f32.mrb[143].mxu1 }
 0x525   :  { %2388 = vst [vmem:[%s4333_s2 + $0xe8] sm:$0xff] %v2347_v59 }

</bundles_post_ra>
